<compile_context>
chip_gen: v7x
topology: tpu7x:2x2x1
jax: 0.10.0
libtpu: 0.0.40
codegen_flags: <defaults>
</compile_context>

<pallas_src>
import functools

import jax
import jax.numpy as jnp
from jax.experimental import pallas as pl
from jax.experimental.pallas import tpu as pltpu  # noqa: F401  (TPU backend)


# ----------------------------------------------------------------------------
# Fused Pallas kernel
# ----------------------------------------------------------------------------

def _full_specs(*arrays):
    # One full-array BlockSpec per input (no grid -> index_map takes no args).
    return [pl.BlockSpec(a.shape, lambda *_, nd=a.ndim: (0,) * nd)
            for a in arrays]


def _fused_forward_kernel(
    # graph data
    xd_ref, ad_ref, pd_ref,
    xp_ref, ap_ref, pp_ref,
    # drug branch parameters
    bn_d_g, bn_d_b, d_w1, d_b1, d_w2, d_b2, d_gw, d_gb,
    # protein branch parameters
    bn_p_g, bn_p_b, p_w1, p_b1, p_w2, p_b2, p_gw, p_gb,
    # head parameters (dense_1 weight pre-split into drug/prot halves)
    h_w1d, h_w1p, h_b1, h_w2, h_b2, h_w3, h_b3,
    # output
    o_ref,
    *, eps, mm_dtype):
    """Entire BertGCNRes forward, everything VMEM-resident, one launch."""

    def dot(a, b):
        # MXU matmul: bf16 operands (v6e/v7x native), f32 accumulation.
        return jnp.dot(a.astype(mm_dtype), b.astype(mm_dtype),
                       preferred_element_type=jnp.float32)

    def branch(x_ref, a_ref, pool_ref, g_ref, b_ref, w1, b1, w2, b2, gw, gb):
        # --- BatchNorm (train-mode stats), fused into the first dense ---
        x = x_ref[...]
        mean = jnp.mean(x, axis=0, keepdims=True)
        var = jnp.mean(jnp.square(x - mean), axis=0, keepdims=True)
        x = (x - mean) * jax.lax.rsqrt(var + eps) * g_ref[...] + b_ref[...]
        # --- GraphLinear + ReLU, twice ---
        x = jnp.maximum(dot(x, w1[...]) + b1[...], 0.0)
        x = jnp.maximum(dot(x, w2[...]) + b2[...], 0.0)
        # --- 3x DeepGCNLayer(GCNConv, ReLU, 'res'): x + ReLU(A_hat X W + b) ---
        a = a_ref[...]                     # A_hat loaded once, reused 3x
        for i in range(gw.shape[0]):       # static unroll over stacked weights
            h = dot(a, dot(x, gw[i])) + gb[i]
            x = x + jnp.maximum(h, 0.0)
        # --- global_mean_pool as [B, N] @ [N, H]  (kept f32 for accuracy) ---
        return jnp.dot(pool_ref[...], x, preferred_element_type=jnp.float32)

    hd = branch(xd_ref, ad_ref, pd_ref, bn_d_g, bn_d_b,
                d_w1, d_b1, d_w2, d_b2, d_gw, d_gb)
    hp = branch(xp_ref, ap_ref, pp_ref, bn_p_g, bn_p_b,
                p_w1, p_b1, p_w2, p_b2, p_gw, p_gb)

    # Head: concat([hd, hp]) @ W1 == hd @ W1[:H] + hp @ W1[H:]  (no concat)
    y = dot(hd, h_w1d[...]) + dot(hp, h_w1p[...]) + h_b1[...]
    y = jnp.maximum(y, 0.0)
    y = jnp.maximum(dot(y, h_w2[...]) + h_b2[...], 0.0)
    # Final [*, 1] projection kept in f32 (tiny, lane-sparse anyway).
    o_ref[...] = jnp.dot(y, h_w3[...],
                         preferred_element_type=jnp.float32) + h_b3[...]


def bert_gcn_res_forward(params, xd_x, ad_hat, pd_mat, xp_x, ap_hat, pp_mat,
                         *, eps=1e-5, mm_dtype=jnp.bfloat16):
    """Single pallas_call for the whole model."""
    n_hidden = params["gcn_d_w"].shape[-1]
    r = lambda b: b.reshape(1, -1)

    inputs = (
        xd_x, ad_hat, pd_mat, xp_x, ap_hat, pp_mat,
        # drug branch
        r(params["bn_d_g"]), r(params["bn_d_b"]),
        params["dense_d1_w"], r(params["dense_d1_b"]),
        params["dense_d2_w"], r(params["dense_d2_b"]),
        params["gcn_d_w"], params["gcn_d_b"],
        # protein branch
        r(params["bn_p_g"]), r(params["bn_p_b"]),
        params["dense_p1_w"], r(params["dense_p1_b"]),
        params["dense_p2_w"], r(params["dense_p2_b"]),
        params["gcn_p_w"], params["gcn_p_b"],
        # head (dense_1 weight split into drug/prot halves -> no concat)
        params["dense_1_w"][:n_hidden], params["dense_1_w"][n_hidden:],
        r(params["dense_1_b"]),
        params["dense_2_w"], r(params["dense_2_b"]),
        params["dense_3_w"], r(params["dense_3_b"]),
    )

    batch = pd_mat.shape[0]
    out_shape = (batch, 1)
    return pl.pallas_call(
        functools.partial(_fused_forward_kernel, eps=eps, mm_dtype=mm_dtype),
        out_shape=jax.ShapeDtypeStruct(out_shape, jnp.float32),
        in_specs=_full_specs(*inputs),
        out_specs=pl.BlockSpec(out_shape, lambda *_: (0, 0)),
    )(*inputs)


# ----------------------------------------------------------------------------
# Graph preprocessing + parameter setup in plain JAX
# ----------------------------------------------------------------------------

def gcn_norm_adj(edge_index, num_nodes):
    """Dense PyG-style gcn_norm: directed A, add_remaining_self_loops,
    A_hat[i,j] = d_i^-1/2 * A[i,j] * d_j^-1/2 with d = in-degree (row sum)."""
    src, dst = edge_index[0], edge_index[1]
    a = jnp.zeros((num_nodes, num_nodes), jnp.float32)
    a = a.at[dst, src].set(1.0)                         # message src -> dst
    a = jnp.maximum(a, jnp.eye(num_nodes, dtype=jnp.float32))  # remaining self-loops
    deg = a.sum(axis=1)
    dinv = jnp.where(deg > 0, jax.lax.rsqrt(deg), 0.0)
    return a * dinv[:, None] * dinv[None, :]


def mean_pool_matrix(batch, num_graphs):
    onehot = (batch[None, :] == jnp.arange(num_graphs)[:, None])
    onehot = onehot.astype(jnp.float32)
    counts = onehot.sum(axis=1, keepdims=True)
    return onehot / jnp.maximum(counts, 1.0)


def init_params(key, num_drug_features, num_prot_features, n_hidden):
    params = {}

    def dense(key, fan_in, fan_out):
        kw, kb = jax.random.split(key)
        scale = 1.0 / jnp.sqrt(jnp.float32(fan_in))
        w = jax.random.uniform(kw, (fan_in, fan_out), jnp.float32, -scale, scale)
        b = jax.random.uniform(kb, (fan_out,), jnp.float32, -scale, scale)
        return w, b

    keys = jax.random.split(key, 16)
    # drug branch
    params["bn_d_g"] = jnp.ones((num_drug_features,), jnp.float32)
    params["bn_d_b"] = jnp.zeros((num_drug_features,), jnp.float32)
    params["dense_d1_w"], params["dense_d1_b"] = dense(
        keys[0], num_drug_features, 2 * n_hidden)
    params["dense_d2_w"], params["dense_d2_b"] = dense(
        keys[1], 2 * n_hidden, n_hidden)
    gws, gbs = zip(*(dense(keys[2 + i], n_hidden, n_hidden) for i in range(3)))
    params["gcn_d_w"] = jnp.stack(gws)            # [3, H, H]
    params["gcn_d_b"] = jnp.stack(gbs)[:, None]   # [3, 1, H]
    # protein branch
    params["bn_p_g"] = jnp.ones((num_prot_features,), jnp.float32)
    params["bn_p_b"] = jnp.zeros((num_prot_features,), jnp.float32)
    params["dense_p1_w"], params["dense_p1_b"] = dense(
        keys[5], num_prot_features, 2 * n_hidden)
    params["dense_p2_w"], params["dense_p2_b"] = dense(
        keys[6], 2 * n_hidden, n_hidden)
    gws, gbs = zip(*(dense(keys[7 + i], n_hidden, n_hidden) for i in range(3)))
    params["gcn_p_w"] = jnp.stack(gws)
    params["gcn_p_b"] = jnp.stack(gbs)[:, None]
    # head
    params["dense_1_w"], params["dense_1_b"] = dense(keys[10], 2 * n_hidden, 256)
    params["dense_2_w"], params["dense_2_b"] = dense(keys[11], 256, 128)
    params["dense_3_w"], params["dense_3_b"] = dense(keys[12], 128, 1)
    return params


# TODO(synk): PyG BatchNorm running-stat updates (a training-time side effect)
# are not reproduced; batch statistics are used directly (train-mode math).

if __name__ == "__main__":
    key = jax.random.PRNGKey(0)

    NUM_DRUG_FEATURES = 16
    NUM_PROT_FEATURES = 24
    N_HIDDEN = 32
    N_DRUG_NODES = 24
    N_PROT_NODES = 32
    N_DRUG_EDGES = 48
    N_PROT_EDGES = 64
    BATCH = 2

    k = jax.random.split(key, 8)
    xd_x = jax.random.normal(k[0], (N_DRUG_NODES, NUM_DRUG_FEATURES), jnp.float32)
    xp_x = jax.random.normal(k[1], (N_PROT_NODES, NUM_PROT_FEATURES), jnp.float32)
    xd_edge_index = jax.random.randint(k[2], (2, N_DRUG_EDGES), 0, N_DRUG_NODES)
    xp_edge_index = jax.random.randint(k[3], (2, N_PROT_EDGES), 0, N_PROT_NODES)
    # two graphs per batch: first half of the nodes -> graph 0, second -> graph 1
    xd_batch = (jnp.arange(N_DRUG_NODES) >= N_DRUG_NODES // 2).astype(jnp.int32)
    xp_batch = (jnp.arange(N_PROT_NODES) >= N_PROT_NODES // 2).astype(jnp.int32)

    ad_hat = gcn_norm_adj(xd_edge_index, N_DRUG_NODES)
    ap_hat = gcn_norm_adj(xp_edge_index, N_PROT_NODES)
    pd_mat = mean_pool_matrix(xd_batch, BATCH)
    pp_mat = mean_pool_matrix(xp_batch, BATCH)

    params = init_params(k[4], NUM_DRUG_FEATURES, NUM_PROT_FEATURES, N_HIDDEN)

    fwd = jax.jit(bert_gcn_res_forward)
    pred = fwd(params, xd_x, ad_hat, pd_mat, xp_x, ap_hat, pp_mat)
    pred = jax.block_until_ready(pred)

    assert pred.shape == (BATCH, 1), pred.shape
    assert jnp.all(jnp.isfinite(pred))
    print("KERNEL_OK")
</pallas_src>

<mosaic_0001>
module attributes {stable_mosaic.version = 11 : i64} {
  func.func @_fused_forward_kernel(%arg0: memref<24x16xf32, #tpu.memory_space<vmem>>, %arg1: memref<24x24xf32, #tpu.memory_space<vmem>>, %arg2: memref<2x24xf32, #tpu.memory_space<vmem>>, %arg3: memref<32x24xf32, #tpu.memory_space<vmem>>, %arg4: memref<32x32xf32, #tpu.memory_space<vmem>>, %arg5: memref<2x32xf32, #tpu.memory_space<vmem>>, %arg6: memref<1x16xf32, #tpu.memory_space<vmem>>, %arg7: memref<1x16xf32, #tpu.memory_space<vmem>>, %arg8: memref<16x64xf32, #tpu.memory_space<vmem>>, %arg9: memref<1x64xf32, #tpu.memory_space<vmem>>, %arg10: memref<64x32xf32, #tpu.memory_space<vmem>>, %arg11: memref<1x32xf32, #tpu.memory_space<vmem>>, %arg12: memref<3x32x32xf32, #tpu.memory_space<vmem>>, %arg13: memref<3x1x32xf32, #tpu.memory_space<vmem>>, %arg14: memref<1x24xf32, #tpu.memory_space<vmem>>, %arg15: memref<1x24xf32, #tpu.memory_space<vmem>>, %arg16: memref<24x64xf32, #tpu.memory_space<vmem>>, %arg17: memref<1x64xf32, #tpu.memory_space<vmem>>, %arg18: memref<64x32xf32, #tpu.memory_space<vmem>>, %arg19: memref<1x32xf32, #tpu.memory_space<vmem>>, %arg20: memref<3x32x32xf32, #tpu.memory_space<vmem>>, %arg21: memref<3x1x32xf32, #tpu.memory_space<vmem>>, %arg22: memref<32x256xf32, #tpu.memory_space<vmem>>, %arg23: memref<32x256xf32, #tpu.memory_space<vmem>>, %arg24: memref<1x256xf32, #tpu.memory_space<vmem>>, %arg25: memref<256x128xf32, #tpu.memory_space<vmem>>, %arg26: memref<1x128xf32, #tpu.memory_space<vmem>>, %arg27: memref<128x1xf32, #tpu.memory_space<vmem>>, %arg28: memref<1x1xf32, #tpu.memory_space<vmem>>, %arg29: memref<2x1xf32, #tpu.memory_space<vmem>>) attributes {dimension_semantics = [], scalar_prefetch = 0 : i64, scratch_operands = 0 : i64, tpu.core_type = #tpu.core_type<tc>} {
    %c0 = arith.constant 0 : index
    %c0_0 = arith.constant 0 : index
    %0 = vector.load %arg0[%c0, %c0_0] : memref<24x16xf32, #tpu.memory_space<vmem>>, vector<24x16xf32>
    %cst = arith.constant dense<0.000000e+00> : vector<16xf32>
    %1 = vector.multi_reduction <add>, %0, %cst [0] : vector<24x16xf32> to vector<16xf32>
    %2 = vector.shape_cast %1 : vector<16xf32> to vector<1x16xf32>
    %cst_1 = arith.constant 2.400000e+01 : f32
    %3 = vector.broadcast %cst_1 : f32 to vector<1x16xf32>
    %4 = arith.divf %2, %3 : vector<1x16xf32>
    %5 = vector.broadcast %4 : vector<1x16xf32> to vector<24x16xf32>
    %6 = arith.subf %0, %5 : vector<24x16xf32>
    %7 = arith.mulf %6, %6 : vector<24x16xf32>
    %cst_2 = arith.constant dense<0.000000e+00> : vector<16xf32>
    %8 = vector.multi_reduction <add>, %7, %cst_2 [0] : vector<24x16xf32> to vector<16xf32>
    %9 = vector.shape_cast %8 : vector<16xf32> to vector<1x16xf32>
    %cst_3 = arith.constant 2.400000e+01 : f32
    %10 = vector.broadcast %cst_3 : f32 to vector<1x16xf32>
    %11 = arith.divf %9, %10 : vector<1x16xf32>
    %12 = vector.broadcast %4 : vector<1x16xf32> to vector<24x16xf32>
    %13 = arith.subf %0, %12 : vector<24x16xf32>
    %cst_4 = arith.constant 9.99999974E-6 : f32
    %14 = vector.broadcast %cst_4 : f32 to vector<1x16xf32>
    %15 = arith.addf %11, %14 : vector<1x16xf32>
    %16 = math.rsqrt %15 : vector<1x16xf32>
    %17 = vector.broadcast %16 : vector<1x16xf32> to vector<24x16xf32>
    %18 = arith.mulf %13, %17 : vector<24x16xf32>
    %c0_5 = arith.constant 0 : index
    %c0_6 = arith.constant 0 : index
    %19 = vector.load %arg6[%c0_5, %c0_6] : memref<1x16xf32, #tpu.memory_space<vmem>>, vector<1x16xf32>
    %20 = vector.broadcast %19 : vector<1x16xf32> to vector<24x16xf32>
    %21 = arith.mulf %18, %20 : vector<24x16xf32>
    %c0_7 = arith.constant 0 : index
    %c0_8 = arith.constant 0 : index
    %22 = vector.load %arg7[%c0_7, %c0_8] : memref<1x16xf32, #tpu.memory_space<vmem>>, vector<1x16xf32>
    %23 = vector.broadcast %22 : vector<1x16xf32> to vector<24x16xf32>
    %24 = arith.addf %21, %23 : vector<24x16xf32>
    %c0_9 = arith.constant 0 : index
    %c0_10 = arith.constant 0 : index
    %25 = vector.load %arg8[%c0_9, %c0_10] : memref<16x64xf32, #tpu.memory_space<vmem>>, vector<16x64xf32>
    %26 = arith.truncf %24 : vector<24x16xf32> to vector<24x16xbf16>
    %27 = arith.truncf %25 : vector<16x64xf32> to vector<16x64xbf16>
    %cst_11 = arith.constant dense<0.000000e+00> : vector<24x64xf32>
    %28 = tpu.matmul %26, %27, %cst_11 {dimension_numbers = #tpu.dot_dimension_numbers<[1], [0], [0], [1], [0, 0, 1, 1], [], []>} : vector<24x16xbf16>, vector<16x64xbf16>, vector<24x64xf32> -> vector<24x64xf32>
    %c0_12 = arith.constant 0 : index
    %c0_13 = arith.constant 0 : index
    %29 = vector.load %arg9[%c0_12, %c0_13] : memref<1x64xf32, #tpu.memory_space<vmem>>, vector<1x64xf32>
    %30 = vector.broadcast %29 : vector<1x64xf32> to vector<24x64xf32>
    %31 = arith.addf %28, %30 : vector<24x64xf32>
    %cst_14 = arith.constant 0.000000e+00 : f32
    %32 = vector.broadcast %cst_14 : f32 to vector<24x64xf32>
    %33 = arith.maximumf %31, %32 : vector<24x64xf32>
    %c0_15 = arith.constant 0 : index
    %c0_16 = arith.constant 0 : index
    %34 = vector.load %arg10[%c0_15, %c0_16] : memref<64x32xf32, #tpu.memory_space<vmem>>, vector<64x32xf32>
    %35 = arith.truncf %33 : vector<24x64xf32> to vector<24x64xbf16>
    %36 = arith.truncf %34 : vector<64x32xf32> to vector<64x32xbf16>
    %cst_17 = arith.constant dense<0.000000e+00> : vector<24x32xf32>
    %37 = tpu.matmul %35, %36, %cst_17 {dimension_numbers = #tpu.dot_dimension_numbers<[1], [0], [0], [1], [0, 0, 1, 1], [], []>} : vector<24x64xbf16>, vector<64x32xbf16>, vector<24x32xf32> -> vector<24x32xf32>
    %c0_18 = arith.constant 0 : index
    %c0_19 = arith.constant 0 : index
    %38 = vector.load %arg11[%c0_18, %c0_19] : memref<1x32xf32, #tpu.memory_space<vmem>>, vector<1x32xf32>
    %39 = vector.broadcast %38 : vector<1x32xf32> to vector<24x32xf32>
    %40 = arith.addf %37, %39 : vector<24x32xf32>
    %cst_20 = arith.constant 0.000000e+00 : f32
    %41 = vector.broadcast %cst_20 : f32 to vector<24x32xf32>
    %42 = arith.maximumf %40, %41 : vector<24x32xf32>
    %c0_21 = arith.constant 0 : index
    %c0_22 = arith.constant 0 : index
    %43 = vector.load %arg1[%c0_21, %c0_22] : memref<24x24xf32, #tpu.memory_space<vmem>>, vector<24x24xf32>
    %c0_23 = arith.constant 0 : index
    %c0_24 = arith.constant 0 : index
    %c0_25 = arith.constant 0 : index
    %44 = vector.load %arg12[%c0_23, %c0_24, %c0_25] : memref<3x32x32xf32, #tpu.memory_space<vmem>>, vector<1x32x32xf32>
    %45 = vector.shape_cast %44 : vector<1x32x32xf32> to vector<32x32xf32>
    %46 = arith.truncf %42 : vector<24x32xf32> to vector<24x32xbf16>
    %47 = arith.truncf %45 : vector<32x32xf32> to vector<32x32xbf16>
    %cst_26 = arith.constant dense<0.000000e+00> : vector<24x32xf32>
    %48 = tpu.matmul %46, %47, %cst_26 {dimension_numbers = #tpu.dot_dimension_numbers<[1], [0], [0], [1], [0, 0, 1, 1], [], []>} : vector<24x32xbf16>, vector<32x32xbf16>, vector<24x32xf32> -> vector<24x32xf32>
    %49 = arith.truncf %43 : vector<24x24xf32> to vector<24x24xbf16>
    %50 = arith.truncf %48 : vector<24x32xf32> to vector<24x32xbf16>
    %cst_27 = arith.constant dense<0.000000e+00> : vector<24x32xf32>
    %51 = tpu.matmul %49, %50, %cst_27 {dimension_numbers = #tpu.dot_dimension_numbers<[1], [0], [0], [1], [0, 0, 1, 1], [], []>} : vector<24x24xbf16>, vector<24x32xbf16>, vector<24x32xf32> -> vector<24x32xf32>
    %c0_28 = arith.constant 0 : index
    %c0_29 = arith.constant 0 : index
    %c0_30 = arith.constant 0 : index
    %52 = vector.load %arg13[%c0_28, %c0_29, %c0_30] : memref<3x1x32xf32, #tpu.memory_space<vmem>>, vector<1x1x32xf32>
    %53 = vector.shape_cast %52 : vector<1x1x32xf32> to vector<1x32xf32>
    %54 = vector.broadcast %53 : vector<1x32xf32> to vector<24x32xf32>
    %55 = arith.addf %51, %54 : vector<24x32xf32>
    %cst_31 = arith.constant 0.000000e+00 : f32
    %56 = vector.broadcast %cst_31 : f32 to vector<24x32xf32>
    %57 = arith.maximumf %55, %56 : vector<24x32xf32>
    %58 = arith.addf %42, %57 : vector<24x32xf32>
    %c1 = arith.constant 1 : index
    %c0_32 = arith.constant 0 : index
    %c0_33 = arith.constant 0 : index
    %59 = vector.load %arg12[%c1, %c0_32, %c0_33] : memref<3x32x32xf32, #tpu.memory_space<vmem>>, vector<1x32x32xf32>
    %60 = vector.shape_cast %59 : vector<1x32x32xf32> to vector<32x32xf32>
    %61 = arith.truncf %58 : vector<24x32xf32> to vector<24x32xbf16>
    %62 = arith.truncf %60 : vector<32x32xf32> to vector<32x32xbf16>
    %cst_34 = arith.constant dense<0.000000e+00> : vector<24x32xf32>
    %63 = tpu.matmul %61, %62, %cst_34 {dimension_numbers = #tpu.dot_dimension_numbers<[1], [0], [0], [1], [0, 0, 1, 1], [], []>} : vector<24x32xbf16>, vector<32x32xbf16>, vector<24x32xf32> -> vector<24x32xf32>
    %64 = arith.truncf %43 : vector<24x24xf32> to vector<24x24xbf16>
    %65 = arith.truncf %63 : vector<24x32xf32> to vector<24x32xbf16>
    %cst_35 = arith.constant dense<0.000000e+00> : vector<24x32xf32>
    %66 = tpu.matmul %64, %65, %cst_35 {dimension_numbers = #tpu.dot_dimension_numbers<[1], [0], [0], [1], [0, 0, 1, 1], [], []>} : vector<24x24xbf16>, vector<24x32xbf16>, vector<24x32xf32> -> vector<24x32xf32>
    %c1_36 = arith.constant 1 : index
    %c0_37 = arith.constant 0 : index
    %c0_38 = arith.constant 0 : index
    %67 = vector.load %arg13[%c1_36, %c0_37, %c0_38] : memref<3x1x32xf32, #tpu.memory_space<vmem>>, vector<1x1x32xf32>
    %68 = vector.shape_cast %67 : vector<1x1x32xf32> to vector<1x32xf32>
    %69 = vector.broadcast %68 : vector<1x32xf32> to vector<24x32xf32>
    %70 = arith.addf %66, %69 : vector<24x32xf32>
    %cst_39 = arith.constant 0.000000e+00 : f32
    %71 = vector.broadcast %cst_39 : f32 to vector<24x32xf32>
    %72 = arith.maximumf %70, %71 : vector<24x32xf32>
    %73 = arith.addf %58, %72 : vector<24x32xf32>
    %c2 = arith.constant 2 : index
    %c0_40 = arith.constant 0 : index
    %c0_41 = arith.constant 0 : index
    %74 = vector.load %arg12[%c2, %c0_40, %c0_41] : memref<3x32x32xf32, #tpu.memory_space<vmem>>, vector<1x32x32xf32>
    %75 = vector.shape_cast %74 : vector<1x32x32xf32> to vector<32x32xf32>
    %76 = arith.truncf %73 : vector<24x32xf32> to vector<24x32xbf16>
    %77 = arith.truncf %75 : vector<32x32xf32> to vector<32x32xbf16>
    %cst_42 = arith.constant dense<0.000000e+00> : vector<24x32xf32>
    %78 = tpu.matmul %76, %77, %cst_42 {dimension_numbers = #tpu.dot_dimension_numbers<[1], [0], [0], [1], [0, 0, 1, 1], [], []>} : vector<24x32xbf16>, vector<32x32xbf16>, vector<24x32xf32> -> vector<24x32xf32>
    %79 = arith.truncf %43 : vector<24x24xf32> to vector<24x24xbf16>
    %80 = arith.truncf %78 : vector<24x32xf32> to vector<24x32xbf16>
    %cst_43 = arith.constant dense<0.000000e+00> : vector<24x32xf32>
    %81 = tpu.matmul %79, %80, %cst_43 {dimension_numbers = #tpu.dot_dimension_numbers<[1], [0], [0], [1], [0, 0, 1, 1], [], []>} : vector<24x24xbf16>, vector<24x32xbf16>, vector<24x32xf32> -> vector<24x32xf32>
    %c2_44 = arith.constant 2 : index
    %c0_45 = arith.constant 0 : index
    %c0_46 = arith.constant 0 : index
    %82 = vector.load %arg13[%c2_44, %c0_45, %c0_46] : memref<3x1x32xf32, #tpu.memory_space<vmem>>, vector<1x1x32xf32>
    %83 = vector.shape_cast %82 : vector<1x1x32xf32> to vector<1x32xf32>
    %84 = vector.broadcast %83 : vector<1x32xf32> to vector<24x32xf32>
    %85 = arith.addf %81, %84 : vector<24x32xf32>
    %cst_47 = arith.constant 0.000000e+00 : f32
    %86 = vector.broadcast %cst_47 : f32 to vector<24x32xf32>
    %87 = arith.maximumf %85, %86 : vector<24x32xf32>
    %88 = arith.addf %73, %87 : vector<24x32xf32>
    %c0_48 = arith.constant 0 : index
    %c0_49 = arith.constant 0 : index
    %89 = vector.load %arg2[%c0_48, %c0_49] : memref<2x24xf32, #tpu.memory_space<vmem>>, vector<2x24xf32>
    %cst_50 = arith.constant dense<0.000000e+00> : vector<2x32xf32>
    %90 = tpu.matmul %89, %88, %cst_50 {dimension_numbers = #tpu.dot_dimension_numbers<[1], [0], [0], [1], [0, 0, 1, 1], [], []>} : vector<2x24xf32>, vector<24x32xf32>, vector<2x32xf32> -> vector<2x32xf32>
    %c0_51 = arith.constant 0 : index
    %c0_52 = arith.constant 0 : index
    %91 = vector.load %arg3[%c0_51, %c0_52] : memref<32x24xf32, #tpu.memory_space<vmem>>, vector<32x24xf32>
    %cst_53 = arith.constant dense<0.000000e+00> : vector<24xf32>
    %92 = vector.multi_reduction <add>, %91, %cst_53 [0] : vector<32x24xf32> to vector<24xf32>
    %93 = vector.shape_cast %92 : vector<24xf32> to vector<1x24xf32>
    %cst_54 = arith.constant 3.200000e+01 : f32
    %94 = vector.broadcast %cst_54 : f32 to vector<1x24xf32>
    %95 = arith.divf %93, %94 : vector<1x24xf32>
    %96 = vector.broadcast %95 : vector<1x24xf32> to vector<32x24xf32>
    %97 = arith.subf %91, %96 : vector<32x24xf32>
    %98 = arith.mulf %97, %97 : vector<32x24xf32>
    %cst_55 = arith.constant dense<0.000000e+00> : vector<24xf32>
    %99 = vector.multi_reduction <add>, %98, %cst_55 [0] : vector<32x24xf32> to vector<24xf32>
    %100 = vector.shape_cast %99 : vector<24xf32> to vector<1x24xf32>
    %cst_56 = arith.constant 3.200000e+01 : f32
    %101 = vector.broadcast %cst_56 : f32 to vector<1x24xf32>
    %102 = arith.divf %100, %101 : vector<1x24xf32>
    %103 = vector.broadcast %95 : vector<1x24xf32> to vector<32x24xf32>
    %104 = arith.subf %91, %103 : vector<32x24xf32>
    %cst_57 = arith.constant 9.99999974E-6 : f32
    %105 = vector.broadcast %cst_57 : f32 to vector<1x24xf32>
    %106 = arith.addf %102, %105 : vector<1x24xf32>
    %107 = math.rsqrt %106 : vector<1x24xf32>
    %108 = vector.broadcast %107 : vector<1x24xf32> to vector<32x24xf32>
    %109 = arith.mulf %104, %108 : vector<32x24xf32>
    %c0_58 = arith.constant 0 : index
    %c0_59 = arith.constant 0 : index
    %110 = vector.load %arg14[%c0_58, %c0_59] : memref<1x24xf32, #tpu.memory_space<vmem>>, vector<1x24xf32>
    %111 = vector.broadcast %110 : vector<1x24xf32> to vector<32x24xf32>
    %112 = arith.mulf %109, %111 : vector<32x24xf32>
    %c0_60 = arith.constant 0 : index
    %c0_61 = arith.constant 0 : index
    %113 = vector.load %arg15[%c0_60, %c0_61] : memref<1x24xf32, #tpu.memory_space<vmem>>, vector<1x24xf32>
    %114 = vector.broadcast %113 : vector<1x24xf32> to vector<32x24xf32>
    %115 = arith.addf %112, %114 : vector<32x24xf32>
    %c0_62 = arith.constant 0 : index
    %c0_63 = arith.constant 0 : index
    %116 = vector.load %arg16[%c0_62, %c0_63] : memref<24x64xf32, #tpu.memory_space<vmem>>, vector<24x64xf32>
    %117 = arith.truncf %115 : vector<32x24xf32> to vector<32x24xbf16>
    %118 = arith.truncf %116 : vector<24x64xf32> to vector<24x64xbf16>
    %cst_64 = arith.constant dense<0.000000e+00> : vector<32x64xf32>
    %119 = tpu.matmul %117, %118, %cst_64 {dimension_numbers = #tpu.dot_dimension_numbers<[1], [0], [0], [1], [0, 0, 1, 1], [], []>} : vector<32x24xbf16>, vector<24x64xbf16>, vector<32x64xf32> -> vector<32x64xf32>
    %c0_65 = arith.constant 0 : index
    %c0_66 = arith.constant 0 : index
    %120 = vector.load %arg17[%c0_65, %c0_66] : memref<1x64xf32, #tpu.memory_space<vmem>>, vector<1x64xf32>
    %121 = vector.broadcast %120 : vector<1x64xf32> to vector<32x64xf32>
    %122 = arith.addf %119, %121 : vector<32x64xf32>
    %cst_67 = arith.constant 0.000000e+00 : f32
    %123 = vector.broadcast %cst_67 : f32 to vector<32x64xf32>
    %124 = arith.maximumf %122, %123 : vector<32x64xf32>
    %c0_68 = arith.constant 0 : index
    %c0_69 = arith.constant 0 : index
    %125 = vector.load %arg18[%c0_68, %c0_69] : memref<64x32xf32, #tpu.memory_space<vmem>>, vector<64x32xf32>
    %126 = arith.truncf %124 : vector<32x64xf32> to vector<32x64xbf16>
    %127 = arith.truncf %125 : vector<64x32xf32> to vector<64x32xbf16>
    %cst_70 = arith.constant dense<0.000000e+00> : vector<32x32xf32>
    %128 = tpu.matmul %126, %127, %cst_70 {dimension_numbers = #tpu.dot_dimension_numbers<[1], [0], [0], [1], [0, 0, 1, 1], [], []>} : vector<32x64xbf16>, vector<64x32xbf16>, vector<32x32xf32> -> vector<32x32xf32>
    %c0_71 = arith.constant 0 : index
    %c0_72 = arith.constant 0 : index
    %129 = vector.load %arg19[%c0_71, %c0_72] : memref<1x32xf32, #tpu.memory_space<vmem>>, vector<1x32xf32>
    %130 = vector.broadcast %129 : vector<1x32xf32> to vector<32x32xf32>
    %131 = arith.addf %128, %130 : vector<32x32xf32>
    %cst_73 = arith.constant 0.000000e+00 : f32
    %132 = vector.broadcast %cst_73 : f32 to vector<32x32xf32>
    %133 = arith.maximumf %131, %132 : vector<32x32xf32>
    %c0_74 = arith.constant 0 : index
    %c0_75 = arith.constant 0 : index
    %134 = vector.load %arg4[%c0_74, %c0_75] : memref<32x32xf32, #tpu.memory_space<vmem>>, vector<32x32xf32>
    %c0_76 = arith.constant 0 : index
    %c0_77 = arith.constant 0 : index
    %c0_78 = arith.constant 0 : index
    %135 = vector.load %arg20[%c0_76, %c0_77, %c0_78] : memref<3x32x32xf32, #tpu.memory_space<vmem>>, vector<1x32x32xf32>
    %136 = vector.shape_cast %135 : vector<1x32x32xf32> to vector<32x32xf32>
    %137 = arith.truncf %133 : vector<32x32xf32> to vector<32x32xbf16>
    %138 = arith.truncf %136 : vector<32x32xf32> to vector<32x32xbf16>
    %cst_79 = arith.constant dense<0.000000e+00> : vector<32x32xf32>
    %139 = tpu.matmul %137, %138, %cst_79 {dimension_numbers = #tpu.dot_dimension_numbers<[1], [0], [0], [1], [0, 0, 1, 1], [], []>} : vector<32x32xbf16>, vector<32x32xbf16>, vector<32x32xf32> -> vector<32x32xf32>
    %140 = arith.truncf %134 : vector<32x32xf32> to vector<32x32xbf16>
    %141 = arith.truncf %139 : vector<32x32xf32> to vector<32x32xbf16>
    %cst_80 = arith.constant dense<0.000000e+00> : vector<32x32xf32>
    %142 = tpu.matmul %140, %141, %cst_80 {dimension_numbers = #tpu.dot_dimension_numbers<[1], [0], [0], [1], [0, 0, 1, 1], [], []>} : vector<32x32xbf16>, vector<32x32xbf16>, vector<32x32xf32> -> vector<32x32xf32>
    %c0_81 = arith.constant 0 : index
    %c0_82 = arith.constant 0 : index
    %c0_83 = arith.constant 0 : index
    %143 = vector.load %arg21[%c0_81, %c0_82, %c0_83] : memref<3x1x32xf32, #tpu.memory_space<vmem>>, vector<1x1x32xf32>
    %144 = vector.shape_cast %143 : vector<1x1x32xf32> to vector<1x32xf32>
    %145 = vector.broadcast %144 : vector<1x32xf32> to vector<32x32xf32>
    %146 = arith.addf %142, %145 : vector<32x32xf32>
    %cst_84 = arith.constant 0.000000e+00 : f32
    %147 = vector.broadcast %cst_84 : f32 to vector<32x32xf32>
    %148 = arith.maximumf %146, %147 : vector<32x32xf32>
    %149 = arith.addf %133, %148 : vector<32x32xf32>
    %c1_85 = arith.constant 1 : index
    %c0_86 = arith.constant 0 : index
    %c0_87 = arith.constant 0 : index
    %150 = vector.load %arg20[%c1_85, %c0_86, %c0_87] : memref<3x32x32xf32, #tpu.memory_space<vmem>>, vector<1x32x32xf32>
    %151 = vector.shape_cast %150 : vector<1x32x32xf32> to vector<32x32xf32>
    %152 = arith.truncf %149 : vector<32x32xf32> to vector<32x32xbf16>
    %153 = arith.truncf %151 : vector<32x32xf32> to vector<32x32xbf16>
    %cst_88 = arith.constant dense<0.000000e+00> : vector<32x32xf32>
    %154 = tpu.matmul %152, %153, %cst_88 {dimension_numbers = #tpu.dot_dimension_numbers<[1], [0], [0], [1], [0, 0, 1, 1], [], []>} : vector<32x32xbf16>, vector<32x32xbf16>, vector<32x32xf32> -> vector<32x32xf32>
    %155 = arith.truncf %134 : vector<32x32xf32> to vector<32x32xbf16>
    %156 = arith.truncf %154 : vector<32x32xf32> to vector<32x32xbf16>
    %cst_89 = arith.constant dense<0.000000e+00> : vector<32x32xf32>
    %157 = tpu.matmul %155, %156, %cst_89 {dimension_numbers = #tpu.dot_dimension_numbers<[1], [0], [0], [1], [0, 0, 1, 1], [], []>} : vector<32x32xbf16>, vector<32x32xbf16>, vector<32x32xf32> -> vector<32x32xf32>
    %c1_90 = arith.constant 1 : index
    %c0_91 = arith.constant 0 : index
    %c0_92 = arith.constant 0 : index
    %158 = vector.load %arg21[%c1_90, %c0_91, %c0_92] : memref<3x1x32xf32, #tpu.memory_space<vmem>>, vector<1x1x32xf32>
    %159 = vector.shape_cast %158 : vector<1x1x32xf32> to vector<1x32xf32>
    %160 = vector.broadcast %159 : vector<1x32xf32> to vector<32x32xf32>
    %161 = arith.addf %157, %160 : vector<32x32xf32>
    %cst_93 = arith.constant 0.000000e+00 : f32
    %162 = vector.broadcast %cst_93 : f32 to vector<32x32xf32>
    %163 = arith.maximumf %161, %162 : vector<32x32xf32>
    %164 = arith.addf %149, %163 : vector<32x32xf32>
    %c2_94 = arith.constant 2 : index
    %c0_95 = arith.constant 0 : index
    %c0_96 = arith.constant 0 : index
    %165 = vector.load %arg20[%c2_94, %c0_95, %c0_96] : memref<3x32x32xf32, #tpu.memory_space<vmem>>, vector<1x32x32xf32>
    %166 = vector.shape_cast %165 : vector<1x32x32xf32> to vector<32x32xf32>
    %167 = arith.truncf %164 : vector<32x32xf32> to vector<32x32xbf16>
    %168 = arith.truncf %166 : vector<32x32xf32> to vector<32x32xbf16>
    %cst_97 = arith.constant dense<0.000000e+00> : vector<32x32xf32>
    %169 = tpu.matmul %167, %168, %cst_97 {dimension_numbers = #tpu.dot_dimension_numbers<[1], [0], [0], [1], [0, 0, 1, 1], [], []>} : vector<32x32xbf16>, vector<32x32xbf16>, vector<32x32xf32> -> vector<32x32xf32>
    %170 = arith.truncf %134 : vector<32x32xf32> to vector<32x32xbf16>
    %171 = arith.truncf %169 : vector<32x32xf32> to vector<32x32xbf16>
    %cst_98 = arith.constant dense<0.000000e+00> : vector<32x32xf32>
    %172 = tpu.matmul %170, %171, %cst_98 {dimension_numbers = #tpu.dot_dimension_numbers<[1], [0], [0], [1], [0, 0, 1, 1], [], []>} : vector<32x32xbf16>, vector<32x32xbf16>, vector<32x32xf32> -> vector<32x32xf32>
    %c2_99 = arith.constant 2 : index
    %c0_100 = arith.constant 0 : index
    %c0_101 = arith.constant 0 : index
    %173 = vector.load %arg21[%c2_99, %c0_100, %c0_101] : memref<3x1x32xf32, #tpu.memory_space<vmem>>, vector<1x1x32xf32>
    %174 = vector.shape_cast %173 : vector<1x1x32xf32> to vector<1x32xf32>
    %175 = vector.broadcast %174 : vector<1x32xf32> to vector<32x32xf32>
    %176 = arith.addf %172, %175 : vector<32x32xf32>
    %cst_102 = arith.constant 0.000000e+00 : f32
    %177 = vector.broadcast %cst_102 : f32 to vector<32x32xf32>
    %178 = arith.maximumf %176, %177 : vector<32x32xf32>
    %179 = arith.addf %164, %178 : vector<32x32xf32>
    %c0_103 = arith.constant 0 : index
    %c0_104 = arith.constant 0 : index
    %180 = vector.load %arg5[%c0_103, %c0_104] : memref<2x32xf32, #tpu.memory_space<vmem>>, vector<2x32xf32>
    %cst_105 = arith.constant dense<0.000000e+00> : vector<2x32xf32>
    %181 = tpu.matmul %180, %179, %cst_105 {dimension_numbers = #tpu.dot_dimension_numbers<[1], [0], [0], [1], [0, 0, 1, 1], [], []>} : vector<2x32xf32>, vector<32x32xf32>, vector<2x32xf32> -> vector<2x32xf32>
    %c0_106 = arith.constant 0 : index
    %c0_107 = arith.constant 0 : index
    %182 = vector.load %arg22[%c0_106, %c0_107] : memref<32x256xf32, #tpu.memory_space<vmem>>, vector<32x256xf32>
    %183 = arith.truncf %90 : vector<2x32xf32> to vector<2x32xbf16>
    %184 = arith.truncf %182 : vector<32x256xf32> to vector<32x256xbf16>
    %cst_108 = arith.constant dense<0.000000e+00> : vector<2x256xf32>
    %185 = tpu.matmul %183, %184, %cst_108 {dimension_numbers = #tpu.dot_dimension_numbers<[1], [0], [0], [1], [0, 0, 1, 1], [], []>} : vector<2x32xbf16>, vector<32x256xbf16>, vector<2x256xf32> -> vector<2x256xf32>
    %c0_109 = arith.constant 0 : index
    %c0_110 = arith.constant 0 : index
    %186 = vector.load %arg23[%c0_109, %c0_110] : memref<32x256xf32, #tpu.memory_space<vmem>>, vector<32x256xf32>
    %187 = arith.truncf %181 : vector<2x32xf32> to vector<2x32xbf16>
    %188 = arith.truncf %186 : vector<32x256xf32> to vector<32x256xbf16>
    %cst_111 = arith.constant dense<0.000000e+00> : vector<2x256xf32>
    %189 = tpu.matmul %187, %188, %cst_111 {dimension_numbers = #tpu.dot_dimension_numbers<[1], [0], [0], [1], [0, 0, 1, 1], [], []>} : vector<2x32xbf16>, vector<32x256xbf16>, vector<2x256xf32> -> vector<2x256xf32>
    %190 = arith.addf %185, %189 : vector<2x256xf32>
    %c0_112 = arith.constant 0 : index
    %c0_113 = arith.constant 0 : index
    %191 = vector.load %arg24[%c0_112, %c0_113] : memref<1x256xf32, #tpu.memory_space<vmem>>, vector<1x256xf32>
    %192 = vector.broadcast %191 : vector<1x256xf32> to vector<2x256xf32>
    %193 = arith.addf %190, %192 : vector<2x256xf32>
    %cst_114 = arith.constant 0.000000e+00 : f32
    %194 = vector.broadcast %cst_114 : f32 to vector<2x256xf32>
    %195 = arith.maximumf %193, %194 : vector<2x256xf32>
    %c0_115 = arith.constant 0 : index
    %c0_116 = arith.constant 0 : index
    %196 = vector.load %arg25[%c0_115, %c0_116] : memref<256x128xf32, #tpu.memory_space<vmem>>, vector<256x128xf32>
    %197 = arith.truncf %195 : vector<2x256xf32> to vector<2x256xbf16>
    %198 = arith.truncf %196 : vector<256x128xf32> to vector<256x128xbf16>
    %cst_117 = arith.constant dense<0.000000e+00> : vector<2x128xf32>
    %199 = tpu.matmul %197, %198, %cst_117 {dimension_numbers = #tpu.dot_dimension_numbers<[1], [0], [0], [1], [0, 0, 1, 1], [], []>} : vector<2x256xbf16>, vector<256x128xbf16>, vector<2x128xf32> -> vector<2x128xf32>
    %c0_118 = arith.constant 0 : index
    %c0_119 = arith.constant 0 : index
    %200 = vector.load %arg26[%c0_118, %c0_119] : memref<1x128xf32, #tpu.memory_space<vmem>>, vector<1x128xf32>
    %201 = vector.broadcast %200 : vector<1x128xf32> to vector<2x128xf32>
    %202 = arith.addf %199, %201 : vector<2x128xf32>
    %cst_120 = arith.constant 0.000000e+00 : f32
    %203 = vector.broadcast %cst_120 : f32 to vector<2x128xf32>
    %204 = arith.maximumf %202, %203 : vector<2x128xf32>
    %c0_121 = arith.constant 0 : index
    %c0_122 = arith.constant 0 : index
    %205 = vector.load %arg27[%c0_121, %c0_122] : memref<128x1xf32, #tpu.memory_space<vmem>>, vector<128x1xf32>
    %cst_123 = arith.constant dense<0.000000e+00> : vector<2x1xf32>
    %206 = tpu.matmul %204, %205, %cst_123 {dimension_numbers = #tpu.dot_dimension_numbers<[1], [0], [0], [1], [0, 0, 1, 1], [], []>} : vector<2x128xf32>, vector<128x1xf32>, vector<2x1xf32> -> vector<2x1xf32>
    %c0_124 = arith.constant 0 : index
    %c0_125 = arith.constant 0 : index
    %207 = vector.load %arg28[%c0_124, %c0_125] : memref<1x1xf32, #tpu.memory_space<vmem>>, vector<1x1xf32>
    %208 = vector.broadcast %207 : vector<1x1xf32> to vector<2x1xf32>
    %209 = arith.addf %206, %208 : vector<2x1xf32>
    %c0_126 = arith.constant 0 : index
    %c0_127 = arith.constant 0 : index
    %210 = vector.load %arg29[%c0_126, %c0_127] : memref<2x1xf32, #tpu.memory_space<vmem>>, vector<2x1xf32>
    tpu.vector_store %arg29[%c0_126, %c0_127], %209 {strides = array<i32>} : memref<2x1xf32, #tpu.memory_space<vmem>>, vector<2x1xf32>,
    return
  }
}

</mosaic_0001>

<bundles_post_ra>
// kernel: bert_gcn_res_forward.1
= control target key start
LH: loop header
LB: loop body
LE: loop exit
PB: predicated region body
PF: predicated region fallthrough
CT: control target
= control target key end

     0   :  { %s2681_s6 = smov 1   ;;  %s2682_s10 = smov 2   ;;  %s3158_s0 = inlined_call_operand.smem [shape: u32[30], index: -1, kind: input, shape index: {}] }
   0x1   :  { %s2732_s5 = sld [smem:[%s3158_s0]]   ;;  %s2683_s14 = smov 3  }
   0x2   :  { %s2737_s9 = sld [smem:[%s3158_s0 + %s2681_s6]]   ;;  %s2684_s18 = smov 4  }
   0x3   :  { %s2742_s13 = sld [smem:[%s3158_s0 + %s2682_s10]]   ;;  %s2685_s22 = smov 5  }
   0x4   :  { %s2747_s17 = sld [smem:[%s3158_s0 + %s2683_s14]]   ;;  %s2686_s26 = smov 6  }
   0x5   :  { %s2752_s21 = sld [smem:[%s3158_s0 + %s2684_s18]]   ;;  %s2687_s30 = smov 7  }
   0x6   :  { %s2757_s25 = sld [smem:[%s3158_s0 + %s2685_s22]]   ;;  %s2688_s4 = smov 8  }
   0x7   :  { %s2762_s29 = sld [smem:[%s3158_s0 + %s2686_s26]]   ;;  %s2689_s10 = smov 9  }
   0x8   :  { %s2767_s3 = sld [smem:[%s3158_s0 + %s2687_s30]]   ;;  %s2690_s15 = smov 10  }
   0x9   :  { %3169 = sst [smem:[#allocation25_spill]] %s2742_s13  ;;  %s2691_s20 = smov 11  }
   0xa   :  { %3170 = sst [smem:[#allocation26_spill]] %s2747_s17  ;;  %s2692_s26 = smov 12  }
   0xb   :  { %3171 = sst [smem:[#allocation27_spill]] %s2752_s21  ;;  %s2693_s1 = smov 13  }
   0xc   :  { %3172 = sst [smem:[#allocation28_spill]] %s2757_s25  ;;  %s2694_s7 = smov 14  }
   0xd   :  { %s2772_s8 = sld [smem:[%s3158_s0 + %s2688_s4]]   ;;  %s2696_s22 = smov 16  }
   0xe   :  { %s2777_s14 = sld [smem:[%s3158_s0 + %s2689_s10]]   ;;  %s2697_s28 = smov 17  }
   0xf   :  { %s2782_s19 = sld [smem:[%s3158_s0 + %s2690_s15]]   ;;  %s2695_s15 = smov 15  }
  0x10   :  { %s2787_s24 = sld [smem:[%s3158_s0 + %s2691_s20]]  }
  0x11   :  { %s2792_s30 = sld [smem:[%s3158_s0 + %s2692_s26]]  }
  0x12   :  { %s2797_s6 = sld [smem:[%s3158_s0 + %s2693_s1]]   ;;  %s2709_s1 = smov 29  }
  0x13   :  { %s2802_s12 = sld [smem:[%s3158_s0 + %s2694_s7]]   ;;  %s2698_s7 = smov 18  }
  0x14   :  { %s2807_s20 = sld [smem:[%s3158_s0 + %s2695_s15]]   ;;  %s2699_s15 = smov 19  }
  0x15   :  { %s2812_s27 = sld [smem:[%s3158_s0 + %s2696_s22]]   ;;  %s2700_s22 = smov 20  }
  0x16   :  { %s2817_s4 = sld [smem:[%s3158_s0 + %s2697_s28]]   ;;  %s2701_s28 = smov 21  }
  0x17   :  { %s2822_s25 = sld [smem:[%s3158_s0 + %s2698_s7]]   ;;  %s2702_s7 = smov 22  }
  0x18   :  { %3173 = sst [smem:[#allocation29_spill]] %s2797_s6 }
  0x19   :  { %s2827_s21 = sld [smem:[%s3158_s0 + %s2699_s15]]   ;;  %s2703_s15 = smov 23  }
  0x1a   :  { %s2832_s13 = sld [smem:[%s3158_s0 + %s2700_s22]]   ;;  %s2704_s22 = smov 24  }
  0x1b   :  { %3174 = sst [smem:[#allocation30_spill]] %s2812_s27 }
  0x1c   :  { %s2837_s27 = sld [smem:[%s3158_s0 + %s2701_s28]]   ;;  %s2705_s28 = smov 25  }
  0x1d   :  { %3175 = sst [smem:[#allocation31_spill]] %s2822_s25 }
  0x1e   :  { %s2842_s25 = sld [smem:[%s3158_s0 + %s2702_s7]]   ;;  %s2706_s7 = smov 26  }
  0x1f   :  { %s2847_s17 = sld [smem:[%s3158_s0 + %s2703_s15]]   ;;  %s2707_s15 = smov 27  }
  0x20   :  { %3176 = sst [smem:[#allocation32_spill]] %s2832_s13 }
  0x21   :  { %s2852_s13 = sld [smem:[%s3158_s0 + %s2704_s22]]   ;;  %s2708_s22 = smov 28  }
  0x22   :  { %3177 = sst [smem:[#allocation33_spill]] %s2837_s27 }
  0x23   :  { %s2857_s27 = sld [smem:[%s3158_s0 + %s2705_s28]]  }
  0x24   :  { %3178 = sst [smem:[#allocation34_spill]] %s2842_s25 }
  0x25   :  { %3179 = sst [smem:[#allocation35_spill]] %s2847_s17 }
  0x26   :  { %s2862_s25 = sld [smem:[%s3158_s0 + %s2706_s7]]  }
  0x27   :  { %s2867_s17 = sld [smem:[%s3158_s0 + %s2707_s15]]  }
  0x28   :  { %s1987_s6 = sld [smem:[%s3158_s0 + %s2708_s22]]  }
  0x29   :  { %3180 = sst [smem:[#allocation36_spill]] %s2857_s27 }
  0x2a   :  { %s2875_s27 = sld [smem:[%s3158_s0 + %s2709_s1]]  }
  0x2e   :  { %v64_v0 = vstv %s1987_s6 }
  0x2f   :  { %65 = vst [vmem:[#allocation2] sm:$0x1] %v64_v0 }
  0x30   :  { %66 = vsyncpa [#allocation4], 0 }
  0x31   :  { %67 = vsyncpa [#allocation6], 0 }
  0x32   :  { %68 = vsyncpa [#allocation9], 0 }
  0x33   :  { %69 = vsyncpa [#allocation12], 0 }
  0x34   :  { %70 = vsyncpa [#allocation15], 0 }
  0x35   :  { %71 = vsyncpa [#allocation18], 0  ;;  %s2710_s7 = smov [#allocation5]   ;;  %s2711_s11 = smov [#allocation8]  }
  0x36   :  { %s100_s10 = sshll.u32 %s2710_s7, 4  ;;  %s124_s15 = sshll.u32 %s2711_s11, 4  ;;  %s101_s10 = int_to_ptr.vmem [resolvable:$true] %s100_s10  ;;  %s125_s15 = int_to_ptr.vmem [resolvable:$true] %s124_s15 }
  0x37   :  { %s2449_s16 = scalar_lea.hbm %s2767_s3, 16 }
  0x38   :  { %p2450_p0 = scmp.ne.s32.totalorder %s2767_s3, %s2449_s16  ;;  %p2453_p1 = scmp.lt.u32.totalorder %s2449_s16, %s2767_s3 }
  0x3a   :  { %p2455_p2 = pnand %p2453_p1, %p2450_p0 }
  0x3c   :  { %2458 = shalt.err (!%p2455_p2)
}
  0x3d   :  { %s2459_s0 = scalar_lea.vmem %s101_s10, 16  ;;  %s2463_s6 = scalar_lea.vmem %s101_s10, 32 }
  0x3e   :  { %p2460_p3 = scmp.ne.s32.totalorder %s101_s10, %s2459_s0  ;;  %p2464_p4 = scmp.lt.s32.totalorder %s101_s10, %s101_s10 }
  0x3f   :  { %p2465_p5 = scmp.lt.s32.totalorder %s2463_s6, %s2459_s0 }
  0x41   :  { %p2466_p6 = por %p2465_p5, %p2464_p4 }
  0x43   :  { %p2467_p7 = pnand %p2466_p6, %p2460_p3 }
  0x45   :  { %2470 = shalt.err (!%p2467_p7)
}
  0x46   :  { %103 = dma.hbm_to_vmem [thread:$0]  %s2767_s3, 16, %s101_s10, [#allocation6]  }
  0x47   :  { %s2471_s18 = scalar_lea.hbm %s2787_s24, 16 }
  0x48   :  { %p2472_p8 = scmp.ne.s32.totalorder %s2787_s24, %s2471_s18  ;;  %p2475_p9 = scmp.lt.u32.totalorder %s2471_s18, %s2787_s24 }
  0x4a   :  { %p2477_p10 = pnand %p2475_p9, %p2472_p8 }
  0x4c   :  { %2480 = shalt.err (!%p2477_p10)
}
  0x4d   :  { %s2481_s22 = scalar_lea.vmem %s125_s15, 16  ;;  %s2485_s23 = scalar_lea.vmem %s125_s15, 32 }
  0x4e   :  { %p2482_p11 = scmp.ne.s32.totalorder %s125_s15, %s2481_s22  ;;  %p2486_p12 = scmp.lt.s32.totalorder %s125_s15, %s125_s15 }
  0x4f   :  { %p2487_p13 = scmp.lt.s32.totalorder %s2485_s23, %s2481_s22 }
  0x51   :  { %p2488_p0 = por %p2487_p13, %p2486_p12 }
  0x53   :  { %p2489_p1 = pnand %p2488_p0, %p2482_p11 }
  0x55   :  { %2492 = shalt.err (!%p2489_p1)
}
  0x56   :  { %127 = dma.hbm_to_vmem [thread:$0]  %s2787_s24, 16, %s125_s15, [#allocation9]  }
  0x57   :  { %s2712_s26 = smov [#allocation11]   ;;  %s2713_s1 = smov [#allocation14]  }
  0x58   :  { %s148_s3 = sshll.u32 %s2712_s26, 4  ;;  %s172_s28 = sshll.u32 %s2713_s1, 4  ;;  %s149_s3 = int_to_ptr.vmem [resolvable:$true] %s148_s3  ;;  %s173_s28 = int_to_ptr.vmem [resolvable:$true] %s172_s28 }
  0x59   :  { %s2493_s2 = scalar_lea.hbm %s2807_s20, 16 }
  0x5a   :  { %p2494_p2 = scmp.ne.s32.totalorder %s2807_s20, %s2493_s2  ;;  %p2497_p3 = scmp.lt.u32.totalorder %s2493_s2, %s2807_s20 }
  0x5c   :  { %p2499_p4 = pnand %p2497_p3, %p2494_p2 }
  0x5e   :  { %2502 = shalt.err (!%p2499_p4)
}
  0x5f   :  { %s2503_s7 = scalar_lea.vmem %s149_s3, 16  ;;  %s2507_s10 = scalar_lea.vmem %s149_s3, 32 }
  0x60   :  { %p2504_p5 = scmp.ne.s32.totalorder %s149_s3, %s2503_s7  ;;  %p2508_p6 = scmp.lt.s32.totalorder %s149_s3, %s149_s3 }
  0x61   :  { %p2509_p7 = scmp.lt.s32.totalorder %s2507_s10, %s2503_s7 }
  0x63   :  { %p2510_p8 = por %p2509_p7, %p2508_p6 }
  0x65   :  { %p2511_p9 = pnand %p2510_p8, %p2504_p5 }
  0x67   :  { %2514 = shalt.err (!%p2511_p9)
}
  0x68   :  { %151 = dma.hbm_to_vmem [thread:$0]  %s2807_s20, 16, %s149_s3, [#allocation12]  }
  0x69   :  { %s2515_s24 = scalar_lea.hbm %s2827_s21, 16 }
  0x6a   :  { %p2516_p10 = scmp.ne.s32.totalorder %s2827_s21, %s2515_s24  ;;  %p2519_p11 = scmp.lt.u32.totalorder %s2515_s24, %s2827_s21 }
  0x6c   :  { %p2521_p12 = pnand %p2519_p11, %p2516_p10 }
  0x6e   :  { %2524 = shalt.err (!%p2521_p12)
}
  0x6f   :  { %s2525_s11 = scalar_lea.vmem %s173_s28, 16  ;;  %s2529_s15 = scalar_lea.vmem %s173_s28, 32 }
  0x70   :  { %p2526_p13 = scmp.ne.s32.totalorder %s173_s28, %s2525_s11  ;;  %p2530_p0 = scmp.lt.s32.totalorder %s173_s28, %s173_s28 }
  0x71   :  { %p2531_p1 = scmp.lt.s32.totalorder %s2529_s15, %s2525_s11 }
  0x73   :  { %p2532_p2 = por %p2531_p1, %p2530_p0 }
  0x75   :  { %p2533_p3 = pnand %p2532_p2, %p2526_p13 }
  0x77   :  { %2536 = shalt.err (!%p2533_p3)
}
  0x78   :  { %175 = dma.hbm_to_vmem [thread:$0]  %s2827_s21, 16, %s173_s28, [#allocation15]  }
  0x79   :  { %s2714_s16 = smov [#allocation3]   ;;  %s2715_s0 = smov [#allocation7]  }
  0x7a   :  { %s90_s20 = sshll.u32 %s2714_s16, 4  ;;  %s112_s6 = sshll.u32 %s2715_s0, 4  ;;  %s91_s20 = int_to_ptr.vmem [resolvable:$true] %s90_s20  ;;  %s113_s6 = int_to_ptr.vmem [resolvable:$true] %s112_s6 }
  0x7b   :  { %s2537_s18 = scalar_lea.hbm %s2762_s29, 16 }
  0x7c   :  { %p2538_p4 = scmp.ne.s32.totalorder %s2762_s29, %s2537_s18  ;;  %p2541_p5 = scmp.lt.u32.totalorder %s2537_s18, %s2762_s29 }
  0x7e   :  { %p2543_p6 = pnand %p2541_p5, %p2538_p4 }
  0x80   :  { %2546 = shalt.err (!%p2543_p6)
}
  0x81   :  { %s2547_s22 = scalar_lea.vmem %s91_s20, 16  ;;  %s2551_s23 = scalar_lea.vmem %s91_s20, 32 }
  0x82   :  { %p2548_p7 = scmp.ne.s32.totalorder %s91_s20, %s2547_s22  ;;  %p2552_p8 = scmp.lt.s32.totalorder %s91_s20, %s91_s20 }
  0x83   :  { %p2553_p9 = scmp.lt.s32.totalorder %s2551_s23, %s2547_s22 }
  0x85   :  { %p2554_p10 = por %p2553_p9, %p2552_p8 }
  0x87   :  { %p2555_p11 = pnand %p2554_p10, %p2548_p7 }
  0x89   :  { %2558 = shalt.err (!%p2555_p11)
}
  0x8a   :  { %93 = dma.hbm_to_vmem [thread:$0]  %s2762_s29, 16, %s91_s20, [#allocation4]  }
  0x8b   :  { %s2559_s21 = scalar_lea.hbm %s2777_s14, 16 }
  0x8c   :  { %p2560_p12 = scmp.ne.s32.totalorder %s2777_s14, %s2559_s21  ;;  %p2563_p13 = scmp.lt.u32.totalorder %s2559_s21, %s2777_s14 }
  0x8e   :  { %p2565_p0 = pnand %p2563_p13, %p2560_p12 }
  0x90   :  { %2568 = shalt.err (!%p2565_p0)
}
  0x91   :  { %s2569_s26 = scalar_lea.vmem %s113_s6, 16  ;;  %s2573_s3 = scalar_lea.vmem %s113_s6, 32 }
  0x92   :  { %p2570_p1 = scmp.ne.s32.totalorder %s113_s6, %s2569_s26  ;;  %p2574_p2 = scmp.lt.s32.totalorder %s113_s6, %s113_s6 }
  0x93   :  { %p2575_p3 = scmp.lt.s32.totalorder %s2573_s3, %s2569_s26 }
  0x95   :  { %p2576_p4 = por %p2575_p3, %p2574_p2 }
  0x97   :  { %p2577_p5 = pnand %p2576_p4, %p2570_p1 }
  0x99   :  { %2580 = shalt.err (!%p2577_p5)
}
  0x9a   :  { %115 = dma.hbm_to_vmem [thread:$0]  %s2777_s14, 16, %s113_s6, [#allocation6]  }
  0x9b   :  { %s2716_s1 = smov [#allocation10]   ;;  %s2717_s28 = smov [#allocation13]  }
  0x9c   :  { %s138_s29 = sshll.u32 %s2716_s1, 4  ;;  %s160_s2 = sshll.u32 %s2717_s28, 4  ;;  %s139_s29 = int_to_ptr.vmem [resolvable:$true] %s138_s29  ;;  %s161_s2 = int_to_ptr.vmem [resolvable:$true] %s160_s2 }
  0x9d   :  { %s2581_s7 = scalar_lea.hbm %s2802_s12, 16 }
  0x9e   :  { %p2582_p6 = scmp.ne.s32.totalorder %s2802_s12, %s2581_s7  ;;  %p2585_p7 = scmp.lt.u32.totalorder %s2581_s7, %s2802_s12 }
  0xa0   :  { %p2587_p8 = pnand %p2585_p7, %p2582_p6 }
  0xa2   :  { %2590 = shalt.err (!%p2587_p8)
}
  0xa3   :  { %s2591_s10 = scalar_lea.vmem %s139_s29, 16  ;;  %s2595_s24 = scalar_lea.vmem %s139_s29, 32 }
  0xa4   :  { %p2592_p9 = scmp.ne.s32.totalorder %s139_s29, %s2591_s10  ;;  %p2596_p10 = scmp.lt.s32.totalorder %s139_s29, %s139_s29 }
  0xa5   :  { %p2597_p11 = scmp.lt.s32.totalorder %s2595_s24, %s2591_s10 }
  0xa7   :  { %p2598_p12 = por %p2597_p11, %p2596_p10 }
  0xa9   :  { %p2599_p13 = pnand %p2598_p12, %p2592_p9 }
  0xab   :  { %2602 = shalt.err (!%p2599_p13)
}
  0xac   :  { %141 = dma.hbm_to_vmem [thread:$0]  %s2802_s12, 16, %s139_s29, [#allocation9]  }
  0xad   :  { %s2603_s14 = scalar_lea.hbm %s2817_s4, 16 }
  0xae   :  { %p2604_p0 = scmp.ne.s32.totalorder %s2817_s4, %s2603_s14  ;;  %p2607_p1 = scmp.lt.u32.totalorder %s2603_s14, %s2817_s4 }
  0xb0   :  { %p2609_p2 = pnand %p2607_p1, %p2604_p0 }
  0xb2   :  { %2612 = shalt.err (!%p2609_p2)
}
  0xb3   :  { %s2613_s11 = scalar_lea.vmem %s161_s2, 16  ;;  %s2617_s15 = scalar_lea.vmem %s161_s2, 32 }
  0xb4   :  { %p2614_p3 = scmp.ne.s32.totalorder %s161_s2, %s2613_s11  ;;  %p2618_p4 = scmp.lt.s32.totalorder %s161_s2, %s161_s2 }
  0xb5   :  { %p2619_p5 = scmp.lt.s32.totalorder %s2617_s15, %s2613_s11 }
  0xb7   :  { %p2620_p6 = por %p2619_p5, %p2618_p4 }
  0xb9   :  { %p2621_p7 = pnand %p2620_p6, %p2614_p3 }
  0xbb   :  { %2624 = shalt.err (!%p2621_p7)
}
  0xbc   :  { %163 = dma.hbm_to_vmem [thread:$0]  %s2817_s4, 16, %s161_s2, [#allocation12]  }
  0xbd   :  { %s2718_s16 = smov [#allocation16]   ;;  %s2719_s20 = smov [#allocation17]  }
  0xbe   :  { %s190_s12 = sshll.u32 %s2718_s16, 4  ;;  %s202_s0 = sshll.u32 %s2719_s20, 4  ;;  %s191_s12 = int_to_ptr.vmem [resolvable:$true] %s190_s12  ;;  %s203_s0 = int_to_ptr.vmem [resolvable:$true] %s202_s0 }
  0xbf   :  { %s2625_s6 = scalar_lea.hbm %s2852_s13, 32 }
  0xc0   :  { %p2626_p8 = scmp.ne.s32.totalorder %s2852_s13, %s2625_s6  ;;  %p2629_p9 = scmp.lt.u32.totalorder %s2625_s6, %s2852_s13 }
  0xc2   :  { %p2631_p10 = pnand %p2629_p9, %p2626_p8 }
  0xc4   :  { %2634 = shalt.err (!%p2631_p10)
}
  0xc5   :  { %s2635_s18 = scalar_lea.vmem %s191_s12, 32  ;;  %p2640_p12 = scmp.lt.s32.totalorder %s191_s12, %s191_s12 }
  0xc6   :  { %p2636_p11 = scmp.ne.s32.totalorder %s191_s12, %s2635_s18  ;;  %p2641_p13 = scmp.lt.s32.totalorder %s2635_s18, %s2635_s18 }
  0xc8   :  { %p2642_p0 = por %p2641_p13, %p2640_p12 }
  0xca   :  { %p2643_p1 = pnand %p2642_p0, %p2636_p11 }
  0xcc   :  { %2646 = shalt.err (!%p2643_p1)
}
  0xcd   :  { %193 = dma.hbm_to_vmem [thread:$0]  %s2852_s13, 32, %s191_s12, [#allocation15]  }
  0xce   :  { %s2647_s4 = scalar_lea.hbm %s2862_s25, 16 }
  0xcf   :  { %p2648_p2 = scmp.ne.s32.totalorder %s2862_s25, %s2647_s4  ;;  %p2651_p3 = scmp.lt.u32.totalorder %s2647_s4, %s2862_s25 }
  0xd1   :  { %p2653_p4 = pnand %p2651_p3, %p2648_p2 }
  0xd3   :  { %2656 = shalt.err (!%p2653_p4)
}
  0xd4   :  { %s2657_s22 = scalar_lea.vmem %s203_s0, 16  ;;  %s2661_s23 = scalar_lea.vmem %s203_s0, 32 }
  0xd5   :  { %p2658_p5 = scmp.ne.s32.totalorder %s203_s0, %s2657_s22  ;;  %p2662_p6 = scmp.lt.s32.totalorder %s203_s0, %s203_s0 }
  0xd6   :  { %p2663_p7 = scmp.lt.s32.totalorder %s2661_s23, %s2657_s22 }
  0xd8   :  { %p2664_p8 = por %p2663_p7, %p2662_p6 }
  0xda   :  { %p2665_p9 = pnand %p2664_p8, %p2658_p5 }
  0xdc   :  { %2668 = shalt.err (!%p2665_p9)
}
  0xdd   :  { %205 = dma.hbm_to_vmem [thread:$0]  %s2862_s25, 16, %s203_s0, [#allocation18]  }
  0xde   :  { %2669 = dma.done.wait [#allocation4], 16  }
  0xdf   :  { %2670 = vsyncadd [#allocation4], 4294967280 }
  0xe0   :  { %2671 = dma.done.wait [#allocation6], 32  }
  0xe1   :  { %2672 = vsyncadd [#allocation6], 4294967264 }
  0xe2   :  { %2673 = dma.done.wait [#allocation9], 32  }
  0xe3   :  { %2674 = vsyncadd [#allocation9], 4294967264 }
  0xe4   :  { %2675 = dma.done.wait [#allocation12], 32  }
  0xe5   :  { %2676 = vsyncadd [#allocation12], 4294967264 }
  0xe6   :  { %2677 = dma.done.wait [#allocation15], 48  }
  0xe7   :  { %2678 = vsyncadd [#allocation15], 4294967248 }
  0xe8   :  { %2679 = dma.done.wait [#allocation18], 16  }
  0xe9   :  { %2680 = vsyncadd [#allocation18], 4294967280  ;;  %vm244_vm0 = vcmask 130048   ;;  %v301_v1 = vld [vmem:[%s2772_s8] sm:$0xff]  ;;  %v302_v2 = vld [vmem:[%s2772_s8 + $0x8] sm:$0xff]  ;;  %vm391_vm1 = vcmask 523264  }
  0xea   :  { %v241_v3 = vld [vmem:[%s2732_s5] sm:$0xff]  ;;  %v305_v4 = vpack.c.bf16 %v302_v2, %v301_v1  ;;  %v242_v5 = vld [vmem:[%s2732_s5 + $0x8] sm:$0xff]  ;;  %v243_v6 = vld [vmem:[%s2732_s5 + $0x10] sm:$0xff]  ;;  %vm460_vm2 = vcmask 261120   ;;  %vm526_vm3 = vcmask 195584   ;;  %vm533_vm4 = vcmask 1043456  }
  0xeb   :  { %v245_v7 = vsel %vm244_vm0, %v241_v3, 0.0  ;;  %v246_v8 = vsel %vm244_vm0, %v242_v5, 0.0  ;;  %v248_v9 = vsel %vm244_vm0, %v243_v6, 0.0  ;;  %v370_v10 = vld [vmem:[%s2782_s19] sm:$0xff]  ;;  %v371_v11 = vld [vmem:[%s2782_s19 + $0x8] sm:$0xff]  ;;  %v372_v14 = vld [vmem:[%s2782_s19 + $0x10] sm:$0xff] }
  0xec   :  { %2176 = vmatprep.subr.bf16.mxu0 %v305_v4  ;;  %v247_v12 = vadd.f32 %v246_v8, %v245_v7  ;;  %v380_v13 = vpack.c.bf16 %v371_v11, %v370_v10  ;;  %v373_v15 = vld [vmem:[%s2782_s19 + $0x18] sm:$0xff]  ;;  %v1989_v45 = vld [vmem:[#allocation3] ss:$0 sm:$0xff]  ;;  %v1990_v49 = vld [vmem:[#allocation5] ss:$0 sm:$0xff]  ;;  %s3181_s5 = sld [smem:[#allocation29_spill]] }
  0xed   :  { %2177 = vmatpush3.bf16.msra.mxu0 %v305_v4  ;;  %v381_v16 = vpack.c.bf16 %v373_v15, %v372_v14  ;;  %v374_v58 = vld [vmem:[%s2782_s19 + $0x20] sm:$0xff]  ;;  %v375_v59 = vld [vmem:[%s2782_s19 + $0x28] sm:$0xff]  ;;  %v376_v61 = vld [vmem:[%s2782_s19 + $0x30] sm:$0xff]  ;;  %s3183_s13 = sld [smem:[#allocation30_spill]]  ;;  %vm2721_vm5 = vmmov 0   ;;  %s3184_s25 = sld [smem:[#allocation31_spill]] }
  0xee   :  { %v249_v17 = vadd.f32 %v248_v9, %v247_v12  ;;  %2182 = vmatprep.subr.bf16.mxu1 %v380_v13  ;;  %v382_v60 = vpack.c.bf16 %v375_v59, %v374_v58  ;;  %v377_v62 = vld [vmem:[%s2782_s19 + $0x38] sm:$0xff]  ;;  %v1991_v0 = vld [vmem:[#allocation7] ss:$0 sm:$0xff]  ;;  %v453_v14 = vld [vmem:[%s2792_s30 + $0x8] sm:$0xff]  ;;  %s3185_s8 = sld [smem:[#allocation25_spill]]  ;;  %s3186_s19 = sld [smem:[#allocation32_spill]] }
  0xef   :  { %2183 = vmatpush3.bf16.msra.mxu1 %v380_v13  ;;  %v383_v63 = vpack.c.bf16 %v377_v62, %v376_v61  ;;  %v452_v13 = vld [vmem:[%s2792_s30] sm:$0xff]  ;;  %s3188_s21 = sld [smem:[#allocation33_spill]]  ;;  %s3189_s26 = sld [smem:[#allocation35_spill]]  ;;  %vm1948_vm6 = vcmask 1024  }
  0xf0   :  { %v250_v18 = vrot.slane %v249_v17, 4  ;;  %2184 = vmatprep.subr.bf16.mxu1 %v381_v16  ;;  %v458_v15 = vpack.c.bf16 %v453_v14, %v452_v13  ;;  %v2015_v13 = vld [vmem:[%s2792_s30 + $0x58] sm:$0xff]  ;;  %s3190_s3 = sld [smem:[#allocation34_spill]]  ;;  %s3191_s1 = sld [smem:[#allocation28_spill]] }
  0xf1   :  { %s3192_s29 = sld [smem:[#allocation36_spill]] }
  0xf2   :  { %v251_v19 = vadd.f32 %v250_v18, %v249_v17  ;;  %2194 = vmatprep.subr.bf16.mxu0 %v458_v15  ;;  %v455_v17 = vld [vmem:[%s2792_s30 + $0x18] sm:$0xff] }
  0xf3   :  { %2185 = vmatpush3.bf16.msra.mxu1 %v381_v16  ;;  %v454_v16 = vld [vmem:[%s2792_s30 + $0x10] sm:$0xff] }
  0xf4   :  { %v252_v20 = vrot.slane %v251_v19, 2  ;;  %2186 = vmatprep.subr.bf16.mxu1 %v382_v60  ;;  %v459_v18 = vpack.c.bf16 %v455_v17, %v454_v16 }
  0xf6   :  { %v253_v21 = vadd.f32 %v252_v20, %v251_v19  ;;  %v1994_v19 = vld [vmem:[#allocation8] ss:$0 sm:$0xff] }
  0xf7   :  { %2187 = vmatpush3.bf16.msra.mxu1 %v382_v60 }
  0xf8   :  { %v254_v22 = vrot.slane %v253_v21, 1  ;;  %2188 = vmatprep.subr.bf16.mxu1 %v383_v63 }
  0xfa   :  { %v255_v23 = vadd.f32 %v254_v22, %v253_v21 }
  0xfb   :  { %2189 = vmatpush3.bf16.msra.mxu1 %v383_v63 }
  0xfc   :  { %v257_v24 = vmul.f32 0.041666668, %v255_v23 }
  0xfe   :  { %v258_v25 = vsub.f32 %v241_v3, %v257_v24  ;;  %v259_v26 = vsub.f32 %v242_v5, %v257_v24  ;;  %v260_v27 = vsub.f32 %v243_v6, %v257_v24 }
 0x100   :  { %v261_v28 = vmul.f32 %v258_v25, %v258_v25  ;;  %v262_v29 = vmul.f32 %v259_v26, %v259_v26  ;;  %v263_v30 = vmul.f32 %v260_v27, %v260_v27 }
 0x102   :  { %v264_v31 = vsel %vm244_vm0, %v261_v28, 0.0  ;;  %v265_v32 = vsel %vm244_vm0, %v262_v29, 0.0  ;;  %v267_v33 = vsel %vm244_vm0, %v263_v30, 0.0 }
 0x103   :  { %v266_v34 = vadd.f32 %v265_v32, %v264_v31  ;;  %v449_v32 = vld [vmem:[%s2737_s9] sm:$0xff] }
 0x105   :  { %v268_v35 = vadd.f32 %v267_v33, %v266_v34  ;;  %v450_v33 = vld [vmem:[%s2737_s9 + $0x8] sm:$0xff] }
 0x106   :  { %v515_v34 = vpack.c.bf16 %v450_v33, %v449_v32 }
 0x107   :  { %v269_v36 = vrot.slane %v268_v35, 4 }
 0x109   :  { %v270_v37 = vadd.f32 %v269_v36, %v268_v35 }
 0x10b   :  { %v271_v38 = vrot.slane %v270_v37, 2 }
 0x10d   :  { %v272_v39 = vadd.f32 %v271_v38, %v270_v37 }
 0x10f   :  { %v273_v40 = vrot.slane %v272_v39, 1 }
 0x111   :  { %v274_v41 = vadd.f32 %v273_v40, %v272_v39 }
 0x113   :  { %v275_v42 = vmul.f32 0.041666668, %v274_v41  ;;  %v451_v41 = vld [vmem:[%s2737_s9 + $0x10] sm:$0xff]  ;;  %s3182_s9 = sld [smem:[#allocation26_spill]] }
 0x115   :  { %v276_v43 = vadd.f32 1e-05, %v275_v42 }
 0x117   :  { %2445 = vrsqrt.f32 %v276_v43  ;;  %v2952_v43 = vpack.c.bf16 %v451_v41, %v451_v41 }
 0x119   :  { %v926_v32 = vld [vmem:[%s3182_s9 + $0x8] sm:$0xff] }
 0x121   :  { %v2446_v44 = vpop.eup %2445 }
 0x122   :  { %v278_v46 = vmul.f32 %v2446_v44, %v258_v25  ;;  %v279_v47 = vmul.f32 %v2446_v44, %v259_v26  ;;  %v280_v48 = vmul.f32 %v2446_v44, %v260_v27  ;;  %v2002_v44 = vld [vmem:[%s2792_s30 + $0x20] sm:$0xff] }
 0x124   :  { %v288_v50 = vmul.f32 %v1989_v45, %v278_v46  ;;  %v289_v51 = vmul.f32 %v1989_v45, %v279_v47  ;;  %v290_v52 = vmul.f32 %v1989_v45, %v280_v48  ;;  %v2003_v45 = vld [vmem:[%s2792_s30 + $0x28] sm:$0xff]  ;;  %v2004_v47 = vld [vmem:[%s2792_s30 + $0x30] sm:$0xff]  ;;  %v2005_v48 = vld [vmem:[%s2792_s30 + $0x38] sm:$0xff] }
 0x125   :  { %v598_v46 = vpack.c.bf16 %v2003_v45, %v2002_v44 }
 0x126   :  { %v298_v53 = vadd.f32 %v1990_v49, %v288_v50  ;;  %v299_v54 = vadd.f32 %v1990_v49, %v289_v51  ;;  %v300_v55 = vadd.f32 %v1990_v49, %v290_v52  ;;  %v599_v49 = vpack.c.bf16 %v2005_v48, %v2004_v47  ;;  %v1999_v50 = vld [vmem:[%s3181_s5] ss:$0 sm:$0xff] }
 0x127   :  { %2210 = vmatprep.subr.bf16.mxu1 %v598_v46 }
 0x128   :  { %v303_v56 = vpack.c.bf16 %v299_v54, %v298_v53  ;;  %v304_v57 = vpack.c.bf16 %v300_v55, %v300_v55 }
 0x12a   :  { %2178 = vmatprep.mubr.msk.bf16.mxu0 %vm244_vm0, %v303_v56 }
 0x12b   :  { %2179 = vmatmul.mubr.msk.bf16.vlgmr.msra.gmra.mrb[0].mxu0 %vm244_vm0, %v304_v57 }
 0x12c   :  { %2195 = vmatpush3.bf16.msra.mxu0 %v458_v15  ;;  %v2009_v15 = vld [vmem:[%s3181_s5 + $0x1] ss:$0 sm:$0xff] }
 0x12d   :  { %2196 = vmatprep.subr.bf16.mxu0 %v459_v18 }
 0x130   :  { %2197 = vmatpush3.bf16.msra.mxu0 %v459_v18 }
 0x1fe   :  { %v2180_v1 = vpop.f32.mrb[0].mxu0 }
 0x1ff   :  { %v362_v2 = vadd.f32 %v2180_v1, %v1991_v0  ;;  %v353_v3 = vpop.f32.mrb[1].mxu0 }
 0x200   :  { %v354_v4 = vadd.f32 %v1991_v0, %v353_v3  ;;  %v2181_v5 = vpop.f32.mrb[2].mxu0 }
 0x201   :  { %v356_v6 = vpop.f32.mrb[3].mxu0  ;;  %v369_v8 = vmax.f32 %v362_v2, 0.0 }
 0x202   :  { %v357_v7 = vadd.f32 %v1991_v0, %v356_v6  ;;  %v367_v9 = vmax.f32 %v354_v4, 0.0 }
 0x203   :  { %v379_v12 = vpack.c.bf16 %v369_v8, %v369_v8 }
 0x204   :  { %v368_v10 = vmax.f32 %v357_v7, 0.0 }
 0x206   :  { %v378_v11 = vpack.c.bf16 %v368_v10, %v367_v9  ;;  %v2012_v9 = vld [vmem:[%s2792_s30 + $0x40] sm:$0xff]  ;;  %v2013_v10 = vld [vmem:[%s2792_s30 + $0x48] sm:$0xff] }
 0x208   :  { %2190 = vmatprep.mubr.msk.bf16.mxu1 %vm391_vm1, %v378_v11  ;;  %v728_v11 = vpack.c.bf16 %v2013_v10, %v2012_v9 }
 0x209   :  { %2191 = vmatmul.mubr.msk.bf16.vlgmr.msra.gmra.mrb[0].mxu1 %vm391_vm1, %v379_v12  ;;  %v2014_v12 = vld [vmem:[%s2792_s30 + $0x50] sm:$0xff]  ;;  %s3187_s30 = sld [smem:[#allocation27_spill]] }
 0x20a   :  { %2211 = vmatpush3.bf16.msra.mxu1 %v598_v46  ;;  %v729_v14 = vpack.c.bf16 %v2015_v13, %v2014_v12  ;;  %v2023_v13 = vld [vmem:[#allocation10] ss:$0 sm:$0xff] }
 0x20b   :  { %2212 = vmatprep.subr.bf16.mxu1 %v599_v49 }
 0x20e   :  { %2213 = vmatpush3.bf16.msra.mxu1 %v599_v49 }
 0x20f   :  { %2226 = vmatprep.subr.bf16.mxu1 %v728_v11 }
 0x2dc   :  { %v2192_v20 = vpop.f32.mrb[0].mxu1 }
 0x2dd   :  { %v441_v21 = vadd.f32 %v2192_v20, %v1994_v19  ;;  %v432_v22 = vpop.f32.mrb[1].mxu1 }
 0x2de   :  { %v433_v23 = vadd.f32 %v1994_v19, %v432_v22  ;;  %v2193_v24 = vpop.f32.mrb[2].mxu1 }
 0x2df   :  { %v435_v25 = vpop.f32.mrb[3].mxu1  ;;  %v448_v27 = vmax.f32 %v441_v21, 0.0 }
 0x2e0   :  { %v436_v26 = vadd.f32 %v1994_v19, %v435_v25  ;;  %v446_v28 = vmax.f32 %v433_v23, 0.0 }
 0x2e1   :  { %v457_v31 = vpack.c.bf16 %v448_v27, %v448_v27 }
 0x2e2   :  { %v447_v29 = vmax.f32 %v436_v26, 0.0 }
 0x2e4   :  { %v456_v30 = vpack.c.bf16 %v447_v29, %v446_v28 }
 0x2e6   :  { %2198 = vmatprep.mubr.msk.bf16.mxu0 %vm460_vm2, %v456_v30 }
 0x2e7   :  { %2199 = vmatmul.mubr.msk.bf16.vlgmr.msra.gmra.mrb[4].mxu0 %vm460_vm2, %v457_v31  ;;  %v925_v31 = vld [vmem:[%s3182_s9] sm:$0xff] }
 0x2e8   :  { %2206 = vmatprep.mubr.msk.bf16.mxu0 %vm526_vm3, %v515_v34  ;;  %v929_v33 = vsel %vm526_vm3, %v925_v31, 0.0 }
 0x3ba   :  { %v2200_v35 = vpop.f32.mrb[4].mxu0 }
 0x3bb   :  { %v501_v36 = vpop.f32.mrb[5].mxu0  ;;  %v518_v40 = vpack.c.bf16 %v2200_v35, %v2200_v35  ;;  %v927_v35 = vld [vmem:[%s3182_s9 + $0x10] sm:$0xff] }
 0x3bc   :  { %v2201_v37 = vpop.f32.mrb[6].mxu0 }
 0x3bd   :  { %v504_v38 = vpop.f32.mrb[7].mxu0  ;;  %v535_v42 = vsel %vm533_vm4, %v518_v40, 0  ;;  %v932_v37 = vsel %vm526_vm3, %v927_v35, 0.0 }
 0x3be   :  { %v517_v39 = vpack.c.bf16 %v504_v38, %v501_v36  ;;  %v928_v38 = vld [vmem:[%s3182_s9 + $0x18] sm:$0xff] }
 0x3c0   :  { %2202 = vmatprep.subr.bf16.mxu0 %v517_v39 }
 0x3c1   :  { %2203 = vmatpush3.bf16.msra.mxu0 %v517_v39 }
 0x3c2   :  { %2398 = vmatprep.subr.msk.bf16.mxu0 %vm533_vm4, %v518_v40  ;;  %v934_v40 = vsel %vm526_vm3, %v928_v38, 0.0 }
 0x3c5   :  { %2205 = vmatpush3.bf16.msra.mxu0 %v535_v42 }
 0x3c8   :  { %2207 = vmatmul.mubr.msk.bf16.vlgmr.msra.gmra.mrb[8].mxu0 %vm526_vm3, %v2952_v43 }
 0x3c9   :  { %2222 = vmatprep.mubr.msk.bf16.mxu0 %vm526_vm3, %v515_v34 }
 0x49b   :  { %v2208_v51 = vpop.f32.mrb[8].mxu0 }
 0x49c   :  { %v580_v52 = vadd.f32 %v2208_v51, %v1999_v50  ;;  %v571_v53 = vpop.f32.mrb[9].mxu0 }
 0x49d   :  { %v572_v54 = vadd.f32 %v1999_v50, %v571_v53  ;;  %v2209_v55 = vpop.f32.mrb[10].mxu0 }
 0x49e   :  { %v587_v56 = vmax.f32 %v580_v52, 0.0  ;;  %v574_v57 = vpop.f32.mrb[11].mxu0 }
 0x49f   :  { %v585_v58 = vmax.f32 %v572_v54, 0.0  ;;  %v575_v59 = vadd.f32 %v1999_v50, %v574_v57 }
 0x4a0   :  { %v590_v61 = vadd.f32 %v587_v56, %v448_v27 }
 0x4a1   :  { %v586_v60 = vmax.f32 %v575_v59, 0.0  ;;  %v588_v62 = vadd.f32 %v585_v58, %v446_v28 }
 0x4a2   :  { %v597_v1 = vpack.c.bf16 %v590_v61, %v590_v61 }
 0x4a3   :  { %v589_v63 = vadd.f32 %v586_v60, %v447_v29 }
 0x4a5   :  { %v596_v0 = vpack.c.bf16 %v589_v63, %v588_v62 }
 0x4a7   :  { %2214 = vmatprep.mubr.msk.bf16.mxu1 %vm460_vm2, %v596_v0 }
 0x4a8   :  { %2215 = vmatmul.mubr.msk.bf16.vlgmr.msra.gmra.mrb[4].mxu1 %vm460_vm2, %v597_v1 }
 0x4a9   :  { %2227 = vmatpush3.bf16.msra.mxu1 %v728_v11 }
 0x4aa   :  { %2228 = vmatprep.subr.bf16.mxu1 %v729_v14 }
 0x4ad   :  { %2229 = vmatpush3.bf16.msra.mxu1 %v729_v14 }
 0x57b   :  { %v2216_v2 = vpop.f32.mrb[4].mxu1 }
 0x57c   :  { %v640_v3 = vpop.f32.mrb[5].mxu1  ;;  %v655_v7 = vpack.c.bf16 %v2216_v2, %v2216_v2 }
 0x57d   :  { %v2217_v4 = vpop.f32.mrb[6].mxu1 }
 0x57e   :  { %v643_v5 = vpop.f32.mrb[7].mxu1  ;;  %v665_v8 = vsel %vm533_vm4, %v655_v7, 0 }
 0x57f   :  { %v654_v6 = vpack.c.bf16 %v643_v5, %v640_v3 }
 0x581   :  { %2218 = vmatprep.subr.bf16.mxu0 %v654_v6 }
 0x582   :  { %2219 = vmatpush3.bf16.msra.mxu0 %v654_v6 }
 0x583   :  { %2399 = vmatprep.subr.msk.bf16.mxu0 %vm533_vm4, %v655_v7 }
 0x586   :  { %2221 = vmatpush3.bf16.msra.mxu0 %v665_v8 }
 0x589   :  { %2223 = vmatmul.mubr.msk.bf16.vlgmr.msra.gmra.mrb[12].mxu0 %vm526_vm3, %v2952_v43 }
 0x58a   :  { %2238 = vmatprep.mubr.msk.bf16.mxu0 %vm526_vm3, %v515_v34  ;;  %v930_v34 = vsel %vm526_vm3, %v926_v32, 0.0 }
 0x58b   :  { %v931_v36 = vadd.f32 %v930_v34, %v929_v33 }
 0x58d   :  { %v933_v39 = vadd.f32 %v932_v37, %v931_v36 }
 0x58f   :  { %v935_v41 = vadd.f32 %v934_v40, %v933_v39 }
 0x591   :  { %v936_v42 = vrot.slane %v935_v41, 4 }
 0x593   :  { %v937_v44 = vadd.f32 %v936_v42, %v935_v41  ;;  %v2720_v42 = vmov 0.0|0.0  }
 0x594   :  { %2365 = vmatprep.subr.bf16.mxu1 %v2720_v42 }
 0x595   :  { %v938_v45 = vrot.slane %v937_v44, 2 }
 0x597   :  { %v939_v46 = vadd.f32 %v938_v45, %v937_v44  ;;  %v2722_v44 = vmov 0.0  }
 0x599   :  { %v940_v47 = vrot.slane %v939_v46, 1 }
 0x59b   :  { %v941_v48 = vadd.f32 %v940_v47, %v939_v46 }
 0x59d   :  { %v943_v49 = vmul.f32 0.03125, %v941_v48 }
 0x59f   :  { %v944_v50 = vsub.f32 %v925_v31, %v943_v49  ;;  %v945_v51 = vsub.f32 %v926_v32, %v943_v49  ;;  %v946_v52 = vsub.f32 %v927_v35, %v943_v49  ;;  %v947_v55 = vsub.f32 %v928_v38, %v943_v49  ;;  %v996_v32 = vld [vmem:[%s3183_s13 + $0x10] sm:$0xff] }
 0x5a0   :  { %v1000_v37 = vpack.c.bf16 %v996_v32, %v996_v32 }
 0x5a1   :  { %v948_v53 = vmul.f32 %v944_v50, %v944_v50  ;;  %v949_v54 = vmul.f32 %v945_v51, %v945_v51  ;;  %v950_v56 = vmul.f32 %v946_v52, %v946_v52  ;;  %v951_v60 = vmul.f32 %v947_v55, %v947_v55 }
 0x5a2   :  { %v1015_v40 = vsel %vm533_vm4, %v1000_v37, 0 }
 0x5a3   :  { %v952_v57 = vsel %vm526_vm3, %v948_v53, 0.0  ;;  %v953_v58 = vsel %vm526_vm3, %v949_v54, 0.0  ;;  %v2025_v54 = vld [vmem:[#allocation13] ss:$0 sm:$0xff] }
 0x5a4   :  { %v954_v59 = vadd.f32 %v953_v58, %v952_v57 }
 0x65c   :  { %v2224_v16 = vpop.f32.mrb[12].mxu0 }
 0x65d   :  { %v710_v17 = vadd.f32 %v2224_v16, %v2009_v15  ;;  %v701_v18 = vpop.f32.mrb[13].mxu0 }
 0x65e   :  { %v702_v19 = vadd.f32 %v2009_v15, %v701_v18  ;;  %v2225_v20 = vpop.f32.mrb[14].mxu0 }
 0x65f   :  { %v717_v21 = vmax.f32 %v710_v17, 0.0  ;;  %v704_v22 = vpop.f32.mrb[15].mxu0  ;;  %v2024_v20 = vld [vmem:[#allocation11] ss:$0 sm:$0xff] }
 0x660   :  { %v715_v23 = vmax.f32 %v702_v19, 0.0  ;;  %v705_v24 = vadd.f32 %v2009_v15, %v704_v22  ;;  %v995_v22 = vld [vmem:[%s3183_s13 + $0x8] sm:$0xff] }
 0x661   :  { %v2974_v26 = vadd.f32 %v717_v21, %v590_v61  ;;  %v955_v61 = vsel %vm526_vm3, %v950_v56, 0.0  ;;  %v994_v21 = vld [vmem:[%s3183_s13] sm:$0xff] }
 0x662   :  { %v716_v25 = vmax.f32 %v705_v24, 0.0  ;;  %v2976_v27 = vadd.f32 %v715_v23, %v588_v62  ;;  %v956_v62 = vadd.f32 %v955_v61, %v954_v59  ;;  %v999_v31 = vpack.c.bf16 %v995_v22, %v994_v21  ;;  %v1155_v21 = vld [vmem:[%s3186_s19 + $0x8] sm:$0xff] }
 0x663   :  { %v727_v30 = vpack.c.bf16 %v2974_v26, %v2974_v26 }
 0x664   :  { %v2978_v28 = vadd.f32 %v716_v25, %v589_v63  ;;  %v957_v63 = vsel %vm526_vm3, %v951_v60, 0.0 }
 0x665   :  { %v958_v0 = vadd.f32 %v957_v63, %v956_v62  ;;  %v1070_v62 = vld [vmem:[%s3184_s25] sm:$0xff]  ;;  %v1071_v63 = vld [vmem:[%s3184_s25 + $0x8] sm:$0xff] }
 0x666   :  { %v726_v29 = vpack.c.bf16 %v2978_v28, %v2976_v27 }
 0x667   :  { %v959_v1 = vrot.slane %v958_v0, 4 }
 0x668   :  { %2230 = vmatprep.mubr.msk.bf16.mxu1 %vm460_vm2, %v726_v29 }
 0x669   :  { %2231 = vmatmul.mubr.msk.bf16.vlgmr.msra.gmra.mrb[8].mxu1 %vm460_vm2, %v727_v30  ;;  %v960_v2 = vadd.f32 %v959_v1, %v958_v0 }
 0x66a   :  { %2248 = vmatprep.mubr.msk.f32.mxu1 %vm2721_vm5, %v2722_v44 }
 0x66b   :  { %v961_v3 = vrot.slane %v960_v2, 2 }
 0x66d   :  { %v962_v4 = vadd.f32 %v961_v3, %v960_v2 }
 0x66f   :  { %v963_v5 = vrot.slane %v962_v4, 1 }
 0x671   :  { %v964_v6 = vadd.f32 %v963_v5, %v962_v4  ;;  %v1072_v5 = vld [vmem:[%s3184_s25 + $0x10] sm:$0xff] }
 0x673   :  { %v965_v7 = vmul.f32 0.03125, %v964_v6 }
 0x675   :  { %v966_v8 = vadd.f32 1e-05, %v965_v7  ;;  %v1080_v7 = vpack.c.bf16 %v1071_v63, %v1070_v62  ;;  %v2038_v63 = vld [vmem:[%s3186_s19 + $0x30] sm:$0xff] }
 0x677   :  { %2447 = vrsqrt.f32 %v966_v8 }
 0x681   :  { %v2448_v9 = vpop.eup %2447 }
 0x682   :  { %v968_v10 = vmul.f32 %v2448_v9, %v944_v50  ;;  %v969_v11 = vmul.f32 %v2448_v9, %v945_v51  ;;  %v970_v24 = vmul.f32 %v2448_v9, %v946_v52  ;;  %v971_v25 = vmul.f32 %v2448_v9, %v947_v55 }
 0x684   :  { %v979_v17 = vmul.f32 %v2023_v13, %v968_v10  ;;  %v980_v18 = vmul.f32 %v2023_v13, %v969_v11  ;;  %v981_v34 = vmul.f32 %v2023_v13, %v970_v24  ;;  %v982_v35 = vmul.f32 %v2023_v13, %v971_v25  ;;  %v851_v10 = vld [vmem:[%s3185_s8] sm:$0x3]  ;;  %v1157_v24 = vld [vmem:[%s3186_s19 + $0x18] sm:$0xff] }
 0x686   :  { %v990_v29 = vadd.f32 %v2024_v20, %v979_v17  ;;  %v991_v30 = vadd.f32 %v2024_v20, %v980_v18  ;;  %v992_v38 = vadd.f32 %v2024_v20, %v981_v34  ;;  %v993_v39 = vadd.f32 %v2024_v20, %v982_v35  ;;  %v1076_v17 = vld [vmem:[%s3184_s25 + $0x30] sm:$0xff]  ;;  %v1077_v18 = vld [vmem:[%s3184_s25 + $0x38] sm:$0xff]  ;;  %v1154_v20 = vld [vmem:[%s3186_s19] sm:$0xff] }
 0x687   :  { %v1160_v22 = vpack.c.bf16 %v1155_v21, %v1154_v20 }
 0x688   :  { %v997_v36 = vpack.c.bf16 %v991_v30, %v990_v29  ;;  %v998_v41 = vpack.c.bf16 %v993_v39, %v992_v38 }
 0x73c   :  { %v2232_v12 = vpop.f32.mrb[8].mxu1 }
 0x73d   :  { %v770_v14 = vpop.f32.mrb[9].mxu1  ;;  %v785_v23 = vpack.c.bf16 %v2232_v12, %v2232_v12 }
 0x73e   :  { %v2233_v15 = vpop.f32.mrb[10].mxu1 }
 0x73f   :  { %v773_v16 = vpop.f32.mrb[11].mxu1  ;;  %v795_v33 = vsel %vm533_vm4, %v785_v23, 0  ;;  %v1074_v15 = vld [vmem:[%s3184_s25 + $0x20] sm:$0xff] }
 0x740   :  { %v784_v19 = vpack.c.bf16 %v773_v16, %v770_v14  ;;  %v1075_v16 = vld [vmem:[%s3184_s25 + $0x28] sm:$0xff] }
 0x742   :  { %2234 = vmatprep.subr.bf16.mxu0 %v784_v19 }
 0x743   :  { %2235 = vmatpush3.bf16.msra.mxu0 %v784_v19  ;;  %v1083_v19 = vpack.c.bf16 %v1077_v18, %v1076_v17 }
 0x744   :  { %2400 = vmatprep.subr.msk.bf16.mxu0 %vm533_vm4, %v785_v23  ;;  %v1156_v23 = vld [vmem:[%s3186_s19 + $0x10] sm:$0xff] }
 0x745   :  { %v1161_v25 = vpack.c.bf16 %v1157_v24, %v1156_v23  ;;  %v2046_v24 = vld [vmem:[%s3186_s19 + $0x40] sm:$0xff] }
 0x747   :  { %2237 = vmatpush3.bf16.msra.mxu0 %v795_v33 }
 0x748   :  { %2251 = vmatprep.subr.bf16.mxu0 %v999_v31 }
 0x74a   :  { %2239 = vmatmul.mubr.msk.bf16.vlgmr.msra.gmra.mrb[16].mxu0 %vm526_vm3, %v2952_v43  ;;  %v2019_v43 = vld [vmem:[%s3181_s5 + $0x2] ss:$0 sm:$0xff] }
 0x74b   :  { %2252 = vmatpush3.bf16.msra.mxu0 %v999_v31  ;;  %2255 = vmatprep.mubr.msk.bf16.mxu0 %vm526_vm3, %v997_v36  ;;  %v2028_v31 = vld [vmem:[#allocation14] ss:$0 sm:$0xff] }
 0x74c   :  { %2401 = vmatprep.subr.msk.bf16.mxu0 %vm533_vm4, %v1000_v37 }
 0x74f   :  { %2254 = vmatpush3.bf16.msra.mxu0 %v1015_v40 }
 0x750   :  { %2271 = vmatprep.subr.bf16.mxu0 %v1160_v22 }
 0x752   :  { %2256 = vmatmul.mubr.msk.bf16.vlgmr.msra.gmra.mrb[20].mxu0 %vm526_vm3, %v998_v41 }
 0x753   :  { %2272 = vmatpush3.bf16.msra.mxu0 %v1160_v22 }
 0x754   :  { %2273 = vmatprep.subr.bf16.mxu0 %v1161_v25 }
 0x757   :  { %2274 = vmatpush3.bf16.msra.mxu0 %v1161_v25  ;;  %v2047_v25 = vld [vmem:[%s3186_s19 + $0x48] sm:$0xff] }
 0x81d   :  { %v2240_v45 = vpop.f32.mrb[16].mxu0 }
 0x81e   :  { %v831_v46 = vpop.f32.mrb[17].mxu0  ;;  %v840_v52 = vadd.f32 %v2240_v45, %v2019_v43 }
 0x81f   :  { %v832_v47 = vadd.f32 %v2019_v43, %v831_v46  ;;  %v2241_v48 = vpop.f32.mrb[18].mxu0 }
 0x820   :  { %v834_v49 = vpop.f32.mrb[19].mxu0  ;;  %v847_v60 = vmax.f32 %v840_v52, 0.0  ;;  %v1150_v48 = vld [vmem:[%s3187_s30] sm:$0xff] }
 0x821   :  { %v845_v50 = vmax.f32 %v832_v47, 0.0  ;;  %v835_v51 = vadd.f32 %v2019_v43, %v834_v49  ;;  %v1151_v49 = vld [vmem:[%s3187_s30 + $0x8] sm:$0xff] }
 0x822   :  { %v850_v9 = vadd.f32 %v847_v60, %v2974_v26  ;;  %v1082_v26 = vpack.c.bf16 %v1075_v16, %v1074_v15  ;;  %v2036_v60 = vld [vmem:[%s3186_s19 + $0x20] sm:$0xff] }
 0x823   :  { %v846_v53 = vmax.f32 %v835_v51, 0.0  ;;  %v848_v55 = vadd.f32 %v845_v50, %v2976_v27  ;;  %v1217_v50 = vpack.c.bf16 %v1151_v49, %v1150_v48 }
 0x825   :  { %v849_v56 = vadd.f32 %v846_v53, %v2978_v28  ;;  %v2257_v57 = vpop.f32.mrb[20].mxu0  ;;  %v1073_v28 = vld [vmem:[%s3184_s25 + $0x18] sm:$0xff] }
 0x826   :  { %v1060_v58 = vadd.f32 %v2257_v57, %v2025_v54  ;;  %v1051_v59 = vpop.f32.mrb[21].mxu0  ;;  %v1081_v12 = vpack.c.bf16 %v1073_v28, %v1072_v5  ;;  %v1152_v57 = vld [vmem:[%s3187_s30 + $0x10] sm:$0xff] }
 0x827   :  { %v2366_v61 = vpack.c.bf16 %v849_v56, %v848_v55  ;;  %v1052_v0 = vadd.f32 %v2025_v54, %v1051_v59  ;;  %v2258_v1 = vpop.f32.mrb[22].mxu0 }
 0x828   :  { %v1068_v2 = vmax.f32 %v1060_v58, 0.0  ;;  %v1063_v3 = vadd.f32 %v2258_v1, %v2025_v54  ;;  %v1054_v4 = vpop.f32.mrb[23].mxu0  ;;  %v1153_v58 = vld [vmem:[%s3187_s30 + $0x18] sm:$0xff] }
 0x829   :  { %2367 = vmatpush3.bf16.msra.mxu1 %v2366_v61  ;;  %v1066_v27 = vmax.f32 %v1052_v0, 0.0  ;;  %v1055_v6 = vadd.f32 %v2025_v54, %v1054_v4  ;;  %v3042_v59 = vpack.c.bf16 %v1153_v58, %v1152_v57  ;;  %v2037_v61 = vld [vmem:[%s3186_s19 + $0x28] sm:$0xff]  ;;  %v2039_v0 = vld [vmem:[%s3186_s19 + $0x38] sm:$0xff] }
 0x82a   :  { %2246 = vmatprep.subr.mxu1 %v2722_v44  ;;  %v1069_v8 = vmax.f32 %v1063_v3, 0.0  ;;  %v1298_v62 = vpack.c.bf16 %v2037_v61, %v2036_v60  ;;  %v1299_v1 = vpack.c.bf16 %v2039_v0, %v2038_v63  ;;  %v1641_v63 = vld [vmem:[%s3189_s26 + $0x8] sm:$0xff]  ;;  %v1643_v0 = vld [vmem:[%s3189_s26 + $0x18] sm:$0xff] }
 0x82b   :  { %v1067_v11 = vmax.f32 %v1055_v6, 0.0 }
 0x82c   :  { %v1079_v13 = vpack.c.bf16 %v1069_v8, %v1068_v2  ;;  %v2033_v2 = vld [vmem:[%s3188_s21] ss:$0 sm:$0xff] }
 0x82d   :  { %2247 = vmatpush3.msra.mxu1 %v850_v9  ;;  %v1078_v14 = vpack.c.bf16 %v1067_v11, %v1066_v27 }
 0x82e   :  { %2259 = vmatprep.subr.bf16.mxu1 %v1080_v7  ;;  %2249 = vmatmul.mubr.msk.f32.vlgmr.msra.gmra.mrb[12].mxu1 %vm526_vm3, %v851_v10 }
 0x82f   :  { %2260 = vmatpush3.bf16.msra.mxu1 %v1080_v7  ;;  %2267 = vmatprep.mubr.msk.bf16.mxu1 %vm391_vm1, %v1078_v14 }
 0x830   :  { %2261 = vmatprep.subr.bf16.mxu1 %v1081_v12 }
 0x833   :  { %2262 = vmatpush3.bf16.msra.mxu1 %v1081_v12 }
 0x834   :  { %2263 = vmatprep.subr.bf16.mxu1 %v1082_v26 }
 0x837   :  { %2264 = vmatpush3.bf16.msra.mxu1 %v1082_v26 }
 0x838   :  { %2265 = vmatprep.subr.bf16.mxu1 %v1083_v19 }
 0x83b   :  { %2266 = vmatpush3.bf16.msra.mxu1 %v1083_v19 }
 0x83c   :  { %2287 = vmatprep.subr.bf16.mxu1 %v1298_v62 }
 0x83e   :  { %2268 = vmatmul.mubr.msk.bf16.vlgmr.msra.gmra.mrb[16].mxu1 %vm391_vm1, %v1079_v13 }
 0x83f   :  { %2288 = vmatpush3.bf16.msra.mxu1 %v1298_v62  ;;  %v2723_v62 = vmov 0  }
 0x840   :  { %2289 = vmatprep.subr.bf16.mxu1 %v1299_v1 }
 0x843   :  { %2290 = vmatpush3.bf16.msra.mxu1 %v1299_v1  ;;  %v1640_v1 = vld [vmem:[%s3189_s26] sm:$0xff] }
 0x901   :  { %v3033_v29 = vpop.f32.mrb[12].mxu1 }
 0x902   :  { %v2250_v30 = vpop.f32.mrb[13].mxu1 }
 0x903   :  { %v1429_v30 = vpack.c.bf16 %v2047_v25, %v2046_v24  ;;  %v1630_v24 = vld [vmem:[%s3190_s3 + $0x18] sm:$0xff] }
 0x905   :  { %2303 = vmatprep.subr.bf16.mxu1 %v1429_v30 }
 0x911   :  { %v2269_v32 = vpop.f32.mrb[16].mxu1 }
 0x912   :  { %v1131_v33 = vpop.f32.mrb[17].mxu1  ;;  %v1140_v36 = vadd.f32 %v2269_v32, %v2028_v31  ;;  %v2049_v32 = vld [vmem:[%s3186_s19 + $0x58] sm:$0xff] }
 0x913   :  { %v1132_v34 = vadd.f32 %v2028_v31, %v1131_v33  ;;  %v2270_v35 = vpop.f32.mrb[18].mxu1 }
 0x914   :  { %v1143_v37 = vadd.f32 %v2270_v35, %v2028_v31  ;;  %v1134_v38 = vpop.f32.mrb[19].mxu1  ;;  %v1148_v45 = vmax.f32 %v1140_v36, 0.0 }
 0x915   :  { %v1135_v39 = vadd.f32 %v2028_v31, %v1134_v38  ;;  %v1146_v41 = vmax.f32 %v1132_v34, 0.0  ;;  %v2048_v31 = vld [vmem:[%s3186_s19 + $0x50] sm:$0xff]  ;;  %v2043_v34 = vld [vmem:[%s3188_s21 + $0x1] ss:$0 sm:$0xff] }
 0x916   :  { %v1149_v40 = vmax.f32 %v1143_v37, 0.0  ;;  %v1430_v33 = vpack.c.bf16 %v2049_v32, %v2048_v31  ;;  %v1629_v31 = vld [vmem:[%s3190_s3 + $0x10] sm:$0xff]  ;;  %v1632_v32 = vld [vmem:[%s3190_s3 + $0x28] sm:$0xff] }
 0x917   :  { %v1147_v43 = vmax.f32 %v1135_v39, 0.0 }
 0x918   :  { %v1159_v47 = vpack.c.bf16 %v1149_v40, %v1148_v45 }
 0x919   :  { %v1158_v46 = vpack.c.bf16 %v1147_v43, %v1146_v41 }
 0x91b   :  { %2275 = vmatprep.mubr.msk.bf16.mxu0 %vm460_vm2, %v1158_v46 }
 0x91c   :  { %2276 = vmatmul.mubr.msk.bf16.vlgmr.msra.gmra.mrb[24].mxu0 %vm460_vm2, %v1159_v47 }
 0x91d   :  { %2283 = vmatprep.mubr.msk.bf16.mxu0 %vm460_vm2, %v1217_v50 }
 0x9ef   :  { %v2277_v51 = vpop.f32.mrb[24].mxu0 }
 0x9f0   :  { %v1202_v52 = vpop.f32.mrb[25].mxu0 }
 0x9f1   :  { %v2278_v53 = vpop.f32.mrb[26].mxu0 }
 0x9f2   :  { %v1220_v54 = vpack.c.bf16 %v2278_v53, %v2277_v51  ;;  %v1205_v55 = vpop.f32.mrb[27].mxu0 }
 0x9f3   :  { %v1219_v56 = vpack.c.bf16 %v1205_v55, %v1202_v52 }
 0x9f5   :  { %2279 = vmatprep.subr.bf16.mxu0 %v1219_v56 }
 0x9f6   :  { %2280 = vmatpush3.bf16.msra.mxu0 %v1219_v56 }
 0x9f7   :  { %2281 = vmatprep.subr.bf16.mxu0 %v1220_v54 }
 0x9fa   :  { %2282 = vmatpush3.bf16.msra.mxu0 %v1220_v54 }
 0x9fd   :  { %2284 = vmatmul.mubr.msk.bf16.vlgmr.msra.gmra.mrb[28].mxu0 %vm460_vm2, %v3042_v59 }
 0x9fe   :  { %2299 = vmatprep.mubr.msk.bf16.mxu0 %vm460_vm2, %v1217_v50 }
 0xad0   :  { %v2285_v3 = vpop.f32.mrb[28].mxu0 }
 0xad1   :  { %v1277_v4 = vadd.f32 %v2285_v3, %v2033_v2  ;;  %v1268_v27 = vpop.f32.mrb[29].mxu0  ;;  %v1642_v3 = vld [vmem:[%s3189_s26 + $0x10] sm:$0xff] }
 0xad2   :  { %v1269_v5 = vadd.f32 %v2033_v2, %v1268_v27  ;;  %v2286_v28 = vpop.f32.mrb[30].mxu0  ;;  %v1647_v27 = vld [vmem:[%s3189_s26 + $0x38] sm:$0xff] }
 0xad3   :  { %v1280_v6 = vadd.f32 %v2286_v28, %v2033_v2  ;;  %v1271_v7 = vpop.f32.mrb[31].mxu0  ;;  %v1285_v10 = vmax.f32 %v1277_v4, 0.0  ;;  %v1645_v4 = vld [vmem:[%s3189_s26 + $0x28] sm:$0xff] }
 0xad4   :  { %v1283_v8 = vmax.f32 %v1269_v5, 0.0  ;;  %v1272_v9 = vadd.f32 %v2033_v2, %v1271_v7  ;;  %v1650_v2 = vpack.c.bf16 %v1643_v0, %v1641_v63  ;;  %v1649_v5 = vpack.c.bf16 %v1642_v3, %v1640_v1  ;;  %v1761_v63 = vld [vmem:[%s3192_s29 + $0x20] sm:$0xff]  ;;  %v1762_v0 = vld [vmem:[%s3192_s29 + $0x28] sm:$0xff]  ;;  %v1779_v1 = vld [vmem:[%s3192_s29 + $0xb0] sm:$0xff] }
 0xad5   :  { %v1286_v11 = vmax.f32 %v1280_v6, 0.0  ;;  %v1289_v16 = vadd.f32 %v1285_v10, %v1148_v45  ;;  %v1652_v28 = vpack.c.bf16 %v1647_v27, %v1645_v4  ;;  %v2053_v6 = vld [vmem:[%s3188_s21 + $0x2] ss:$0 sm:$0xff]  ;;  %v1793_v4 = vpack.c.bf16 %v1762_v0, %v1761_v63 }
 0xad6   :  { %v1284_v12 = vmax.f32 %v1272_v9, 0.0  ;;  %v1287_v14 = vadd.f32 %v1283_v8, %v1146_v41 }
 0xad7   :  { %v1290_v13 = vadd.f32 %v1286_v11, %v1149_v40 }
 0xad8   :  { %v1288_v15 = vadd.f32 %v1284_v12, %v1147_v43 }
 0xad9   :  { %v1297_v17 = vpack.c.bf16 %v1290_v13, %v1289_v16 }
 0xada   :  { %v1296_v26 = vpack.c.bf16 %v1288_v15, %v1287_v14 }
 0xadc   :  { %2291 = vmatprep.mubr.msk.bf16.mxu1 %vm460_vm2, %v1296_v26 }
 0xadd   :  { %2292 = vmatmul.mubr.msk.bf16.vlgmr.msra.gmra.mrb[20].mxu1 %vm460_vm2, %v1297_v17 }
 0xade   :  { %2304 = vmatpush3.bf16.msra.mxu1 %v1429_v30  ;;  %v1627_v30 = vld [vmem:[%s3190_s3] sm:$0xff] }
 0xadf   :  { %2305 = vmatprep.subr.bf16.mxu1 %v1430_v33 }
 0xae2   :  { %2306 = vmatpush3.bf16.msra.mxu1 %v1430_v33  ;;  %v1634_v33 = vld [vmem:[%s3190_s3 + $0x38] sm:$0xff] }
 0xae3   :  { %2368 = vmatprep.subr.bf16.mxu1 %v2720_v42 }
 0xbb0   :  { %v2293_v18 = vpop.f32.mrb[20].mxu1 }
 0xbb1   :  { %v1340_v19 = vpop.f32.mrb[21].mxu1 }
 0xbb2   :  { %v2294_v20 = vpop.f32.mrb[22].mxu1 }
 0xbb3   :  { %v1356_v21 = vpack.c.bf16 %v2294_v20, %v2293_v18  ;;  %v1343_v22 = vpop.f32.mrb[23].mxu1 }
 0xbb4   :  { %v1355_v23 = vpack.c.bf16 %v1343_v22, %v1340_v19 }
 0xbb6   :  { %2295 = vmatprep.subr.bf16.mxu0 %v1355_v23 }
 0xbb7   :  { %2296 = vmatpush3.bf16.msra.mxu0 %v1355_v23  ;;  %v1628_v23 = vld [vmem:[%s3190_s3 + $0x8] sm:$0xff] }
 0xbb8   :  { %2297 = vmatprep.subr.bf16.mxu0 %v1356_v21  ;;  %v1637_v25 = vpack.c.bf16 %v1630_v24, %v1628_v23  ;;  %v1769_v23 = vld [vmem:[%s3192_s29 + $0x60] sm:$0xff]  ;;  %v1770_v24 = vld [vmem:[%s3192_s29 + $0x68] sm:$0xff] }
 0xbbb   :  { %2298 = vmatpush3.bf16.msra.mxu0 %v1356_v21 }
 0xbbe   :  { %2300 = vmatmul.mubr.msk.bf16.vlgmr.msra.gmra.mrb[32].mxu0 %vm460_vm2, %v3042_v59 }
 0xbbf   :  { %2315 = vmatprep.mubr.msk.bf16.mxu0 %vm460_vm2, %v1217_v50 }
 0xc91   :  { %v2301_v35 = vpop.f32.mrb[32].mxu0 }
 0xc92   :  { %v1408_v36 = vadd.f32 %v2301_v35, %v2043_v34  ;;  %v1399_v37 = vpop.f32.mrb[33].mxu0  ;;  %v1636_v35 = vpack.c.bf16 %v1629_v31, %v1627_v30  ;;  %v1787_v30 = vld [vmem:[%s3192_s29 + $0xf0] sm:$0xff]  ;;  %v1788_v31 = vld [vmem:[%s3192_s29 + $0xf8] sm:$0xff] }
 0xc93   :  { %v1400_v38 = vadd.f32 %v2043_v34, %v1399_v37  ;;  %v2302_v39 = vpop.f32.mrb[34].mxu0  ;;  %v1631_v37 = vld [vmem:[%s3190_s3 + $0x20] sm:$0xff] }
 0xc94   :  { %v1411_v40 = vadd.f32 %v2302_v39, %v2043_v34  ;;  %v1402_v41 = vpop.f32.mrb[35].mxu0  ;;  %v1416_v46 = vmax.f32 %v1408_v36, 0.0  ;;  %v1639_v36 = vpack.c.bf16 %v1634_v33, %v1632_v32  ;;  %v1806_v32 = vpack.c.bf16 %v1788_v31, %v1787_v30  ;;  %v1771_v33 = vld [vmem:[%s3192_s29 + $0x70] sm:$0xff] }
 0xc95   :  { %v1414_v43 = vmax.f32 %v1400_v38, 0.0  ;;  %v1403_v45 = vadd.f32 %v2043_v34, %v1402_v41  ;;  %v1553_v34 = vld [vmem:[%s3191_s1] sm:$0x3]  ;;  %v1633_v38 = vld [vmem:[%s3190_s3 + $0x30] sm:$0xff] }
 0xc96   :  { %v1417_v47 = vmax.f32 %v1411_v40, 0.0  ;;  %v1420_v52 = vadd.f32 %v1416_v46, %v1289_v16  ;;  %v1638_v39 = vpack.c.bf16 %v1633_v38, %v1631_v37  ;;  %v1635_v40 = vpack.c.bf16 %v3033_v29, %v3033_v29  ;;  %v1644_v41 = vld [vmem:[%s3189_s26 + $0x20] sm:$0xff]  ;;  %v1856_v37 = vld [vmem:[%s2867_s17 + $0x8] sm:$0xff]  ;;  %v1857_v38 = vld [vmem:[%s2867_s17 + $0x10] sm:$0xff] }
 0xc97   :  { %v1415_v48 = vmax.f32 %v1403_v45, 0.0  ;;  %v1418_v50 = vadd.f32 %v1414_v43, %v1287_v14  ;;  %v1646_v43 = vld [vmem:[%s3189_s26 + $0x30] sm:$0xff]  ;;  %v1773_v46 = vld [vmem:[%s3192_s29 + $0x80] sm:$0xff] }
 0xc98   :  { %v1421_v49 = vadd.f32 %v1417_v47, %v1290_v13  ;;  %v1651_v45 = vpack.c.bf16 %v1646_v43, %v1644_v41  ;;  %v1774_v47 = vld [vmem:[%s3192_s29 + $0x88] sm:$0xff]  ;;  %v1757_v29 = vld [vmem:[%s3192_s29] sm:$0xff] }
 0xc99   :  { %v1419_v51 = vadd.f32 %v1415_v48, %v1288_v15  ;;  %v1799_v48 = vpack.c.bf16 %v1774_v47, %v1773_v46  ;;  %v1859_v43 = vld [vmem:[%s2867_s17 + $0x20] sm:$0xff]  ;;  %v1861_v47 = vld [vmem:[%s2867_s17 + $0x30] sm:$0xff] }
 0xc9a   :  { %v1428_v54 = vpack.c.bf16 %v1421_v49, %v1420_v52 }
 0xc9b   :  { %v1427_v53 = vpack.c.bf16 %v1419_v51, %v1418_v50 }
 0xc9d   :  { %2307 = vmatprep.mubr.msk.bf16.mxu1 %vm460_vm2, %v1427_v53 }
 0xc9e   :  { %2308 = vmatmul.mubr.msk.bf16.vlgmr.msra.gmra.mrb[24].mxu1 %vm460_vm2, %v1428_v54 }
 0xc9f   :  { %2327 = vmatprep.mubr.msk.f32.mxu1 %vm2721_vm5, %v2722_v44 }
 0xd71   :  { %v2309_v55 = vpop.f32.mrb[24].mxu1 }
 0xd72   :  { %v1471_v56 = vpop.f32.mrb[25].mxu1 }
 0xd73   :  { %v2310_v57 = vpop.f32.mrb[26].mxu1 }
 0xd74   :  { %v1487_v58 = vpack.c.bf16 %v2310_v57, %v2309_v55  ;;  %v1474_v60 = vpop.f32.mrb[27].mxu1  ;;  %v1760_v57 = vld [vmem:[%s3192_s29 + $0x18] sm:$0xff] }
 0xd75   :  { %v1486_v61 = vpack.c.bf16 %v1474_v60, %v1471_v56  ;;  %v1759_v56 = vld [vmem:[%s3192_s29 + $0x10] sm:$0xff]  ;;  %v1778_v60 = vld [vmem:[%s3192_s29 + $0xa8] sm:$0xff] }
 0xd77   :  { %2311 = vmatprep.subr.bf16.mxu0 %v1486_v61 }
 0xd78   :  { %2312 = vmatpush3.bf16.msra.mxu0 %v1486_v61  ;;  %v1792_v61 = vpack.c.bf16 %v1760_v57, %v1759_v56  ;;  %v1741_v57 = vld [vmem:[#allocation16] sm:$0x3] }
 0xd79   :  { %2313 = vmatprep.subr.bf16.mxu0 %v1487_v58 }
 0xd7c   :  { %2314 = vmatpush3.bf16.msra.mxu0 %v1487_v58  ;;  %v1777_v58 = vld [vmem:[%s3192_s29 + $0xa0] sm:$0xff] }
 0xd7d   :  { %1656 = vmatprep.subr.bf16.mxu0 %v1650_v2  ;;  %v1780_v2 = vld [vmem:[%s3192_s29 + $0xb8] sm:$0xff] }
 0xd7f   :  { %2316 = vmatmul.mubr.msk.bf16.vlgmr.msra.gmra.mrb[36].mxu0 %vm460_vm2, %v3042_v59 }
 0xd80   :  { %1688 = vmatprep.mubr.bf16.mxu0 %v2723_v62  ;;  %1657 = vmatpush1.bf16.msra.mxu0 %v1649_v5  ;;  %v1802_v5 = vpack.c.bf16 %v1780_v2, %v1779_v1 }
 0xd81   :  { %1658 = vmatprep.subr.bf16.mxu0 %v1652_v28  ;;  %v1763_v28 = vld [vmem:[%s3192_s29 + $0x30] sm:$0xff] }
 0xd84   :  { %1659 = vmatpush1.bf16.msra.mxu0 %v1651_v45  ;;  %v1860_v45 = vld [vmem:[%s2867_s17 + $0x28] sm:$0xff] }
 0xd85   :  { %2137 = vmatprep.subr.bf16.mxu0 %v1799_v48  ;;  %v2381_v46 = vpack.c.bf16 %v1860_v45, %v1859_v43  ;;  %v1862_v48 = vld [vmem:[%s2867_s17 + $0x38] sm:$0xff] }
 0xe52   :  { %v2317_v7 = vpop.f32.mrb[36].mxu0 }
 0xe53   :  { %v1539_v8 = vadd.f32 %v2317_v7, %v2053_v6  ;;  %v1530_v9 = vpop.f32.mrb[37].mxu0 }
 0xe54   :  { %v1531_v59 = vadd.f32 %v2053_v6, %v1530_v9  ;;  %v2318_v10 = vpop.f32.mrb[38].mxu0  ;;  %v1782_v9 = vld [vmem:[%s3192_s29 + $0xc8] sm:$0xff] }
 0xe55   :  { %v1547_v11 = vmax.f32 %v1539_v8, 0.0  ;;  %v1542_v12 = vadd.f32 %v2318_v10, %v2053_v6  ;;  %v1533_v13 = vpop.f32.mrb[39].mxu0  ;;  %v1781_v8 = vld [vmem:[%s3192_s29 + $0xc0] sm:$0xff] }
 0xe56   :  { %v1545_v14 = vmax.f32 %v1531_v59, 0.0  ;;  %v1534_v15 = vadd.f32 %v2053_v6, %v1533_v13  ;;  %v1764_v6 = vld [vmem:[%s3192_s29 + $0x38] sm:$0xff]  ;;  %v1766_v13 = vld [vmem:[%s3192_s29 + $0x48] sm:$0xff] }
 0xe57   :  { %v1548_v16 = vmax.f32 %v1542_v12, 0.0  ;;  %v1551_v17 = vadd.f32 %v1547_v11, %v1420_v52  ;;  %v1794_v10 = vpack.c.bf16 %v1764_v6, %v1763_v28  ;;  %v1803_v11 = vpack.c.bf16 %v1782_v9, %v1781_v8  ;;  %v1765_v12 = vld [vmem:[%s3192_s29 + $0x40] sm:$0xff] }
 0xe58   :  { %v1546_v26 = vmax.f32 %v1534_v15, 0.0  ;;  %v1549_v19 = vadd.f32 %v1545_v14, %v1418_v50  ;;  %v1775_v50 = vld [vmem:[%s3192_s29 + $0x90] sm:$0xff]  ;;  %v1784_v15 = vld [vmem:[%s3192_s29 + $0xd8] sm:$0xff] }
 0xe59   :  { %v1552_v18 = vadd.f32 %v1548_v16, %v1421_v49  ;;  %v1758_v49 = vld [vmem:[%s3192_s29 + $0x8] sm:$0xff]  ;;  %v1783_v14 = vld [vmem:[%s3192_s29 + $0xd0] sm:$0xff]  ;;  %v1795_v16 = vpack.c.bf16 %v1766_v13, %v1765_v12 }
 0xe5a   :  { %v1550_v20 = vadd.f32 %v1546_v26, %v1419_v51  ;;  %v1776_v51 = vld [vmem:[%s3192_s29 + $0x98] sm:$0xff]  ;;  %v1804_v26 = vpack.c.bf16 %v1784_v15, %v1783_v14  ;;  %v2059_v14 = vld [vmem:[#allocation17] ss:$0 sm:$0xff] }
 0xe5b   :  { %v2372_v21 = vpack.c.bf16 %v1552_v18, %v1551_v17  ;;  %v1800_v55 = vpack.c.bf16 %v1776_v51, %v1775_v50  ;;  %v1767_v17 = vld [vmem:[%s3192_s29 + $0x50] sm:$0xff]  ;;  %v1768_v18 = vld [vmem:[%s3192_s29 + $0x58] sm:$0xff]  ;;  %v1864_v50 = vld [vmem:[%s2867_s17 + $0x48] sm:$0xff] }
 0xe5c   :  { %v2369_v22 = vpack.c.bf16 %v1550_v20, %v1549_v19  ;;  %v1796_v19 = vpack.c.bf16 %v1768_v18, %v1767_v17  ;;  %v1785_v20 = vld [vmem:[%s3192_s29 + $0xe0] sm:$0xff] }
 0xe5e   :  { %2370 = vmatpush3.bf16.msra.mxu1 %v2369_v22 }
 0xe5f   :  { %2371 = vmatprep.subr.bf16.mxu1 %v2720_v42 }
 0xe62   :  { %2373 = vmatpush3.bf16.msra.mxu1 %v2372_v21  ;;  %v1786_v21 = vld [vmem:[%s3192_s29 + $0xe8] sm:$0xff] }
 0xe63   :  { %1700 = vmatprep.subr.bf16.mxu1 %v1637_v25  ;;  %v1805_v22 = vpack.c.bf16 %v1786_v21, %v1785_v20  ;;  %v1797_v25 = vpack.c.bf16 %v1770_v24, %v1769_v23  ;;  %v2060_v20 = vld [vmem:[#allocation2] ss:$0 sm:$0xff] }
 0xe65   :  { %2328 = vmatmul.mubr.msk.f32.vlgmr.msra.gmra.mrb[14].mxu1 %vm460_vm2, %v1553_v34  ;;  %v1772_v34 = vld [vmem:[%s3192_s29 + $0x78] sm:$0xff] }
 0xe66   :  { %1701 = vmatpush1.bf16.msra.mxu1 %v1636_v35  ;;  %1732 = vmatprep.mubr.bf16.mxu1 %v2723_v62  ;;  %v1801_v62 = vpack.c.bf16 %v1778_v60, %v1777_v58  ;;  %v1798_v35 = vpack.c.bf16 %v1772_v34, %v1771_v33 }
 0xe67   :  { %1702 = vmatprep.subr.bf16.mxu1 %v1639_v36  ;;  %v1855_v36 = vld [vmem:[%s2867_s17] sm:$0xff] }
 0xe6a   :  { %1703 = vmatpush1.bf16.msra.mxu1 %v1638_v39  ;;  %v2375_v39 = vpack.c.bf16 %v1856_v37, %v1855_v36 }
 0xe6b   :  { %2374 = vmatprep.subr.bf16.mxu1 %v2720_v42 }
 0xe6d   :  { %2058 = vmatmul.mubr.msk.bf16.vlgmr.msra.gmra.mrb[28].mxu1 %vm460_vm2, %v1635_v40  ;;  %v1858_v40 = vld [vmem:[%s2867_s17 + $0x18] sm:$0xff] }
 0xe6e   :  { %2362 = vmatprep.mubr.msk.f32.mxu1 %vm2721_vm5, %v2722_v44  ;;  %v1791_v44 = vpack.c.bf16 %v1758_v49, %v1757_v29  ;;  %2376 = vmatpush3.bf16.msra.mxu1 %v2375_v39  ;;  %v2378_v41 = vpack.c.bf16 %v1858_v40, %v1857_v38  ;;  %v2384_v29 = vpack.c.bf16 %v1862_v48, %v1861_v47  ;;  %v1863_v49 = vld [vmem:[%s2867_s17 + $0x40] sm:$0xff] }
 0xe6f   :  { %2377 = vmatprep.subr.bf16.mxu1 %v2720_v42  ;;  %v2387_v51 = vpack.c.bf16 %v1864_v50, %v1863_v49 }
 0xe72   :  { %2379 = vmatpush3.bf16.msra.mxu1 %v2378_v41 }
 0xe73   :  { %2380 = vmatprep.subr.bf16.mxu1 %v2720_v42 }
 0xe76   :  { %2382 = vmatpush3.bf16.msra.mxu1 %v2381_v46 }
 0xe77   :  { %2383 = vmatprep.subr.bf16.mxu1 %v2720_v42 }
 0xe7a   :  { %2385 = vmatpush3.bf16.msra.mxu1 %v2384_v29 }
 0xe7b   :  { %2386 = vmatprep.subr.bf16.mxu1 %v2720_v42 }
 0xe7e   :  { %2388 = vmatpush3.bf16.msra.mxu1 %v2387_v51 }
 0xe7f   :  { %2389 = vmatprep.subr.bf16.mxu1 %v2720_v42 }
 0xf38   :  { %v1623_v52 = vpop.f32.mrb[14].mxu1 }
 0xf39   :  { %v1648_v53 = vpack.c.bf16 %v1623_v52, %v1623_v52  ;;  %v2329_v54 = vpop.f32.mrb[15].mxu1  ;;  %v1865_v52 = vld [vmem:[%s2867_s17 + $0x50] sm:$0xff] }
 0xf3a   :  { %v1743_v54 = vlaneseq }
 0xf3b   :  { %2057 = vmatmul.mubr.msk.bf16.vlgmr.msra.gmra.mrb[40].mxu0 %vm460_vm2, %v1648_v53 }
 0xf3c   :  { %2138 = vmatpush3.bf16.msra.mxu0 %v1791_v44  ;;  %v1866_v44 = vld [vmem:[%s2867_s17 + $0x58] sm:$0xff] }
 0xf3d   :  { %2139 = vmatprep.subr.bf16.mxu0 %v1800_v55  ;;  %v2390_v53 = vpack.c.bf16 %v1866_v44, %v1865_v52  ;;  %v1744_v55 = vshrl.u32 %v1743_v54, 7 }
 0xf3f   :  { %2391 = vmatpush3.bf16.msra.mxu1 %v2390_v53  ;;  %v1745_v56 = vsub.s32 0, %v1744_v55  ;;  %v1749_v58 = vsub.s32 1, %v1744_v55 }
 0xf40   :  { %v3110_v3 = vpop.f32.mrb[28].mxu1  ;;  %2140 = vmatpush3.bf16.msra.mxu0 %v1792_v61  ;;  %2392 = vmatprep.subr.bf16.mxu1 %v2720_v42 }
 0xf41   :  { %v3112_v27 = vpop.f32.mrb[29].mxu1  ;;  %2141 = vmatprep.subr.bf16.mxu0 %v1801_v62  ;;  %v1746_v60 = vrot.slane %v1741_v57, %v1745_v56  ;;  %v1750_v62 = vrot.slane %v1741_v57, %v1749_v58 }
 0xf42   :  { %v1738_v7 = vpop.f32.mrb[30].mxu1 }
 0xf43   :  { %v1739_v59 = vpop.f32.mrb[31].mxu1 }
 0xf44   :  { %2142 = vmatpush3.bf16.msra.mxu0 %v1793_v4  ;;  %v1867_v59 = vld [vmem:[%s2867_s17 + $0x60] sm:$0xff] }
 0xf45   :  { %2143 = vmatprep.subr.bf16.mxu0 %v1802_v5 }
 0xf48   :  { %2144 = vmatpush3.bf16.msra.mxu0 %v1794_v10  ;;  %v1868_v10 = vld [vmem:[%s2867_s17 + $0x68] sm:$0xff] }
 0xf49   :  { %2145 = vmatprep.subr.bf16.mxu0 %v1803_v11  ;;  %v2393_v11 = vpack.c.bf16 %v1868_v10, %v1867_v59 }
 0xf4b   :  { %2394 = vmatpush3.bf16.msra.mxu1 %v2393_v11 }
 0xf4c   :  { %2146 = vmatpush3.bf16.msra.mxu0 %v1795_v16  ;;  %2395 = vmatprep.subr.bf16.mxu1 %v2720_v42 }
 0xf4d   :  { %2147 = vmatprep.subr.bf16.mxu0 %v1804_v26 }
 0xf50   :  { %2148 = vmatpush3.bf16.msra.mxu0 %v1796_v19 }
 0xf51   :  { %2149 = vmatprep.subr.bf16.mxu0 %v1805_v22 }
 0xf54   :  { %2150 = vmatpush3.bf16.msra.mxu0 %v1797_v25 }
 0xf55   :  { %2151 = vmatprep.subr.bf16.mxu0 %v1806_v32 }
 0xf58   :  { %2152 = vmatpush3.bf16.msra.mxu0 %v1798_v35 }
0x100e   :  { %v1690_v61 = vpop.f32.mrb[40].mxu0 }
0x100f   :  { %v1735_v63 = vadd.f32 %v3110_v3, %v1690_v61  ;;  %v1692_v0 = vpop.f32.mrb[41].mxu0  ;;  %v1869_v3 = vld [vmem:[%s2867_s17 + $0x70] sm:$0xff] }
0x1010   :  { %v1737_v1 = vadd.f32 %v3112_v27, %v1692_v0  ;;  %v1694_v2 = vpop.f32.mrb[42].mxu0  ;;  %v1870_v27 = vld [vmem:[%s2867_s17 + $0x78] sm:$0xff] }
0x1011   :  { %v1753_v4 = vadd.f32 %v1746_v60, %v1735_v63  ;;  %v1695_v5 = vpop.f32.mrb[43].mxu0  ;;  %v2396_v12 = vpack.c.bf16 %v1870_v27, %v1869_v3 }
0x1012   :  { %v1754_v28 = vadd.f32 %v1750_v62, %v1737_v1 }
0x1013   :  { %v1755_v6 = vmax.f32 %v1753_v4, 0.0  ;;  %2397 = vmatpush3.bf16.msra.mxu1 %v2396_v12 }
0x1014   :  { %v1756_v7 = vmax.f32 %v1754_v28, 0.0 }
0x1015   :  { %v1789_v9 = vpack.c.bf16 %v1755_v6, %v1755_v6 }
0x1016   :  { %v1790_v8 = vpack.c.bf16 %v1756_v7, %v1756_v7 }
0x1018   :  { %1846 = vmatprep.mubr.bf16.mxu0 %v1790_v8 }
0x1019   :  { %1847 = vmatmul.mubr.bf16.vlgmr.msra.gmra.mrb[44].mxu0 %v1789_v9 }
0x10ec   :  { %v2153_v13 = vpop.f32.mrb[44].mxu0 }
0x10ed   :  { %v2154_v15 = vpop.f32.mrb[45].mxu0 }
0x10ee   :  { %v2155_v16 = vadd.f32 %v2154_v15, %v2153_v13  ;;  %v2156_v26 = vpop.f32.mrb[46].mxu0 }
0x10ef   :  { %v2157_v17 = vpop.f32.mrb[47].mxu0 }
0x10f0   :  { %v1849_v18 = vadd.f32 %v2155_v16, %v2059_v14 }
0x10f2   :  { %v1854_v19 = vmax.f32 %v1849_v18, 0.0 }
0x10f4   :  { %2363 = vmatmul.mubr.f32.vlgmr.msra.gmra.mrb[32].mxu1 %v1854_v19 }
0x11c7   :  { %v1944_v21 = vpop.f32.mrb[32].mxu1 }
0x11c8   :  { %v1945_v22 = vadd.f32 %v2060_v20, %v1944_v21  ;;  %v2364_v23 = vpop.f32.mrb[33].mxu1 }
0x11ca   :  { %1949 = vst.msk [vmem:[%s2875_s27] sm:$0x3] %vm1948_vm6, %v1945_v22 }
0x11cb   :  { %1954 = vsyncpa [#allocation4], 1 }
0x11cc   :  { %1955 = vsyncpa [#allocation6], 1 }
0x11cd   :  { %1956 = vsyncpa [#allocation9], 1 }
0x11ce   :  { %1957 = vsyncpa [#allocation12], 1 }
0x11cf   :  { %1958 = vsyncpa [#allocation15], 1 }
0x11d0   :  { %1959 = vsyncpa [#allocation18], 1 }

</bundles_post_ra>
